<compile_context>
chip_gen: v7x
topology: tpu7x:2x2x1
jax: 0.10.0
libtpu: 0.0.40
codegen_flags: <defaults>
</compile_context>

<pallas_src>
import math
import functools

import jax
import jax.numpy as jnp
from jax.experimental import pallas as pl
from jax.experimental.pallas import tpu as pltpu

EPS = 1e-5  # LayerNorm eps (PyTorch default)


def _round_up(x, m):
    return ((x + m - 1) // m) * m


def _convnext_kernel(x_ref, xl_ref, xr_ref, wdw_ref, chan_ref,
                     w1_ref, b1_ref, w2_ref, o_ref, *, approx_gelu=True):
    # x_ref : (1, tT, C) current length tile
    # xl_ref: (1, 8, C)  8 rows immediately before the tile (clamped at t == 0)
    # xr_ref: (1, 8, C)  8 rows immediately after the tile (clamped at last t)
    # wdw_ref : (8, C)  depthwise taps (rows 0..6, row 7 zero)
    # chan_ref: (8, C)  packed per-channel params:
    #                   row0=dw bias, row1=gamma, row2=beta, row3=pw2 bias, row4=scale
    t = pl.program_id(1)
    n_t = pl.num_programs(1)
    tT = x_ref.shape[1]
    C = x_ref.shape[2]

    x = x_ref[0].astype(jnp.float32)                    # (tT, C), also residual
    left8 = xl_ref[0].astype(jnp.float32)               # (8, C)
    right8 = xr_ref[0].astype(jnp.float32)              # (8, C)

    # Zero the halos at the sequence edges (conv zero-padding semantics).
    left8 = left8 * jnp.where(t > 0, 1.0, 0.0)
    right8 = right8 * jnp.where(t < n_t - 1, 1.0, 0.0)

    chan = chan_ref[...]
    b_dw = chan[0, :][None, :]
    gamma = chan[1, :][None, :]
    beta = chan[2, :][None, :]
    b2 = chan[3, :][None, :]
    scale = chan[4, :][None, :]

    # Halo-extended tile; every piece is 8-row aligned on the sublane axis.
    xext = jnp.concatenate([left8, x, right8], axis=0)  # (tT + 16, C)
    N = tT + 16
    wdw = wdw_ref[...]                                   # (8, C)

    # ---- depthwise conv1d, kernel_size=7, padding=3, groups=channels ----
    # out[i] = sum_k xext[i + 5 + k] * w[k].  The shifted windows are built
    # with static sublane rotations (XLU) + an aligned slice; no unaligned
    # value slices that could materialize VMEM copies.
    acc = jnp.zeros((tT, C), jnp.float32)
    for k in range(7):                                   # static unrolled taps
        off = 5 + k
        if off % 8 == 0:
            win = xext[off:off + tT, :]                  # sublane-aligned slice
        else:
            # roll by N - off  =>  rolled[j] = xext[(j + off) % N]; rows [0, tT)
            # never wrap because off + tT - 1 < N.
            win = pltpu.roll(xext, shift=N - off, axis=0)[:tT, :]
        acc = acc + win * wdw[k, :][None, :]
    y = acc + b_dw

    # ---- LayerNorm over the channel (lane) dim, one-pass statistics ----
    mean = jnp.mean(y, axis=-1, keepdims=True)
    meansq = jnp.mean(y * y, axis=-1, keepdims=True)
    var = meansq - mean * mean
    y = (y - mean) * jax.lax.rsqrt(var + EPS)
    y = y * gamma + beta

    # ---- pointwise conv1 (C -> H), bf16 MXU, f32 accumulate ----
    h = jnp.dot(y.astype(jnp.bfloat16), w1_ref[...],
                preferred_element_type=jnp.float32)
    h = h + b1_ref[0, :][None, :]

    # ---- GELU ----
    if approx_gelu:
        # tanh approximation: the transcendental goes to the EUP slot instead
        # of a long erf polynomial on the VALU (the previous binding slot).
        c0 = 0.7978845608028654  # sqrt(2/pi)
        h = 0.5 * h * (1.0 + jnp.tanh(c0 * (h + 0.044715 * (h * h * h))))
    else:
        # exact erf path (bit-for-bit parity with torch.nn.functional.gelu)
        h = 0.5 * h * (1.0 + jax.lax.erf(h * (1.0 / math.sqrt(2.0))))

    # ---- pointwise conv2 (H -> C), bf16 MXU, f32 accumulate ----
    z = jnp.dot(h.astype(jnp.bfloat16), w2_ref[...],
                preferred_element_type=jnp.float32)
    z = z + b2

    # ---- scale * z + residual ----
    o_ref[0] = (x + scale * z).astype(o_ref.dtype)


def convnext_layer_nlc(x_nlc, packed, *, tile_t=1024, approx_gelu=True):
    """ConvNeXtLayer forward in NLC layout. x_nlc: (B, T, C) f32 -> (B, T, C)."""
    B, T, C = x_nlc.shape
    H = packed["w1"].shape[1]

    # Length tile: large by default (amortizes per-step overhead), multiple of 8.
    tT = _round_up(min(tile_t, _round_up(T, 8)), 8)
    if B == 1:
        # v7x has 2 TensorCores; with B == 1 keep nT >= 2 so the "parallel"
        # T axis can actually split across both cores.
        while tT > 8 and _round_up(T, tT) // tT < 2:
            tT = _round_up(tT // 2, 8)
    Tp = _round_up(T, tT)
    nT = Tp // tT
    R = tT // 8                       # tile length in 8-row (halo) blocks
    n_halo_blocks = Tp // 8

    # Only pad T up to the tile multiple (zeros; dropped again after the call).
    x = x_nlc if Tp == T else jnp.pad(x_nlc, ((0, 0), (0, Tp - T), (0, 0)))

    # VMEM budget computed from the actual working set (not a flat 48 MiB):
    # in/out tiles (double-buffered), xext + shifted windows + temporaries,
    # the (tT, H) hidden activation, and the bf16 weights.
    tile_bytes = tT * C * 4
    est = (4 * tile_bytes            # in + out, double-buffered
           + 13 * tile_bytes         # xext, windows, y/temps
           + 4 * tT * H * 4          # h and GELU temporaries
           + 2 * (C * H + H * C) * 2 # bf16 weights, double-buffered
           + 64 * 1024)
    vmem_limit = int(min(100 * (1 << 20), max(2 * est, 16 * (1 << 20))))

    def kernel(*refs):
        return _convnext_kernel(*refs, approx_gelu=approx_gelu)

    grid_spec = pltpu.PrefetchScalarGridSpec(
        num_scalar_prefetch=0,
        grid=(B, nT),
        in_specs=[
            # current length-tile
            pl.BlockSpec((1, tT, C), lambda b, t: (b, t, 0)),
            # 8-row left halo block (clamped; masked in-kernel at t == 0)
            pl.BlockSpec((1, 8, C),
                         lambda b, t: (b, jnp.maximum(t * R - 1, 0), 0)),
            # 8-row right halo block (clamped; masked in-kernel at t == nT-1)
            pl.BlockSpec((1, 8, C),
                         lambda b, t: (b, jnp.minimum((t + 1) * R,
                                                      n_halo_blocks - 1), 0)),
            pl.BlockSpec((8, C), lambda b, t: (0, 0)),   # depthwise taps
            pl.BlockSpec((8, C), lambda b, t: (0, 0)),   # packed per-channel params
            pl.BlockSpec((C, H), lambda b, t: (0, 0)),   # pw_conv1 weight (bf16)
            pl.BlockSpec((1, H), lambda b, t: (0, 0)),   # pw_conv1 bias
            pl.BlockSpec((H, C), lambda b, t: (0, 0)),   # pw_conv2 weight (bf16)
        ],
        out_specs=pl.BlockSpec((1, tT, C), lambda b, t: (b, t, 0)),
    )

    out = pl.pallas_call(
        kernel,
        out_shape=jax.ShapeDtypeStruct((B, Tp, C), x_nlc.dtype),
        grid_spec=grid_spec,
        compiler_params=pltpu.CompilerParams(
            dimension_semantics=("parallel", "parallel"),
            vmem_limit_bytes=vmem_limit,
        ),
    )(
        x, x, x,
        packed["w_dw"], packed["chan"],
        packed["w1"], packed["b1"], packed["w2"],
    )
    return out[:, :T, :] if Tp != T else out


def convnext_layer(x_ncl, packed, *, tile_t=1024, approx_gelu=True):
    """PyTorch-interface wrapper: x_ncl (B, C, T) -> (B, C, T).

    A stacked Vocoder should call convnext_layer_nlc directly and stay in NLC
    (and may keep activations in bf16) so these boundary transposes — full
    HBM round trips — disappear.
    """
    x_nlc = jnp.transpose(x_ncl, (0, 2, 1))
    y = convnext_layer_nlc(x_nlc, packed, tile_t=tile_t, approx_gelu=approx_gelu)
    return jnp.transpose(y, (0, 2, 1))


def init_params(key, channels, h_channels, scale_init):
    ks = jax.random.split(key, 6)
    # torch dw_conv weight is (C, 1, 7); stored here as (taps, C), padded to 8 taps
    w_dw = 0.1 * jax.random.normal(ks[0], (7, channels), jnp.float32)
    w_dw = jnp.concatenate([w_dw, jnp.zeros((1, channels), jnp.float32)], axis=0)
    return {
        "w_dw": w_dw,
        "b_dw": 0.1 * jax.random.normal(ks[1], (1, channels), jnp.float32),
        "gamma": jnp.ones((1, channels), jnp.float32),
        "beta": jnp.zeros((1, channels), jnp.float32),
        # torch pw_conv1 weight is (H, C, 1); stored transposed (C, H) in bf16
        "w1": (0.1 * jax.random.normal(ks[2], (channels, h_channels),
                                       jnp.float32)).astype(jnp.bfloat16),
        "b1": 0.1 * jax.random.normal(ks[3], (1, h_channels), jnp.float32),
        # torch pw_conv2 weight is (C, H, 1); stored transposed (H, C) in bf16
        "w2": (0.1 * jax.random.normal(ks[4], (h_channels, channels),
                                       jnp.float32)).astype(jnp.bfloat16),
        "b2": 0.1 * jax.random.normal(ks[5], (1, channels), jnp.float32),
        "scale": jnp.full((1, channels), scale_init, jnp.float32),
    }


def pack_params(p):
    """Pack the five (1, C) per-channel vectors into one (8, C) block."""
    C = p["gamma"].shape[-1]
    chan = jnp.concatenate([
        p["b_dw"].reshape(1, C).astype(jnp.float32),
        p["gamma"].reshape(1, C).astype(jnp.float32),
        p["beta"].reshape(1, C).astype(jnp.float32),
        p["b2"].reshape(1, C).astype(jnp.float32),
        p["scale"].reshape(1, C).astype(jnp.float32),
        jnp.zeros((3, C), jnp.float32),
    ], axis=0)
    return {"w_dw": p["w_dw"], "chan": chan,
            "w1": p["w1"], "b1": p["b1"], "w2": p["w2"]}


def reference(x_ncl, params):
    """Pure-JAX reference of the PyTorch forward (exact-erf GELU, same bf16 dots)."""
    x = jnp.transpose(x_ncl, (0, 2, 1)).astype(jnp.float32)   # (B, T, C)
    T = x.shape[1]
    xp = jnp.pad(x, ((0, 0), (3, 3), (0, 0)))
    y = sum(xp[:, k:k + T, :] * params["w_dw"][k][None, None, :] for k in range(7))
    y = y + params["b_dw"][0][None, None, :]
    mean = jnp.mean(y, axis=-1, keepdims=True)
    var = jnp.mean((y - mean) ** 2, axis=-1, keepdims=True)
    y = (y - mean) / jnp.sqrt(var + EPS)
    y = y * params["gamma"][0] + params["beta"][0]
    h = jnp.dot(y.astype(jnp.bfloat16), params["w1"],
                preferred_element_type=jnp.float32) + params["b1"][0]
    h = 0.5 * h * (1.0 + jax.lax.erf(h / math.sqrt(2.0)))
    z = jnp.dot(h.astype(jnp.bfloat16), params["w2"],
                preferred_element_type=jnp.float32) + params["b2"][0]
    out = x + params["scale"][0] * z
    return jnp.transpose(out, (0, 2, 1))


if __name__ == "__main__":
    # Lane-dense small test: C=128, H=256.  T=328 (not a tile multiple) so the
    # T-padding path, interior halos and both sequence edges are exercised.
    B, C, H, T = 2, 128, 256, 328
    key = jax.random.PRNGKey(0)
    kx, kp = jax.random.split(key)
    x = jax.random.normal(kx, (B, C, T), jnp.float32)
    params = init_params(kp, channels=C, h_channels=H, scale_init=1.0 / 6.0)
    packed = pack_params(params)
    ref = reference(x, params)

    # Case 1: multi-tile grid (2, 3) — interior halos + edges + T padding.
    layer1 = jax.jit(functools.partial(convnext_layer, tile_t=128))
    out1 = jax.block_until_ready(layer1(x, packed))
    assert out1.shape == (B, C, T)
    assert jnp.allclose(out1, ref, atol=2e-2, rtol=2e-2), \
        f"case1 mismatch, max abs err = {float(jnp.max(jnp.abs(out1 - ref)))}"

    # Case 2: B == 1 with the default large tile — the nT>=2 TC-split cap kicks in.
    layer2 = jax.jit(convnext_layer)
    out2 = jax.block_until_ready(layer2(x[:1], packed))
    assert jnp.allclose(out2, ref[:1], atol=2e-2, rtol=2e-2), \
        f"case2 mismatch, max abs err = {float(jnp.max(jnp.abs(out2 - ref[:1])))}"

    # Case 3: exact-erf GELU parity path (matches the PyTorch default activation).
    layer3 = jax.jit(functools.partial(convnext_layer, tile_t=128, approx_gelu=False))
    out3 = jax.block_until_ready(layer3(x, packed))
    assert jnp.allclose(out3, ref, atol=2e-2, rtol=2e-2), \
        f"case3 mismatch, max abs err = {float(jnp.max(jnp.abs(out3 - ref)))}"

    print("KERNEL_OK")
</pallas_src>

<mosaic_0001>
module attributes {stable_mosaic.version = 11 : i64} {
  func.func @kernel(%arg0: i32, %arg1: i32, %arg2: memref<1x128x128xf32, #tpu.memory_space<vmem>>, %arg3: memref<1x8x128xf32, #tpu.memory_space<vmem>>, %arg4: memref<1x8x128xf32, #tpu.memory_space<vmem>>, %arg5: memref<8x128xf32, #tpu.memory_space<vmem>>, %arg6: memref<8x128xf32, #tpu.memory_space<vmem>>, %arg7: memref<128x256xbf16, #tpu.memory_space<vmem>>, %arg8: memref<1x256xf32, #tpu.memory_space<vmem>>, %arg9: memref<256x128xbf16, #tpu.memory_space<vmem>>, %arg10: memref<1x128x128xf32, #tpu.memory_space<vmem>>) attributes {dimension_semantics = [#tpu.dimension_semantics<parallel>, #tpu.dimension_semantics<parallel>], iteration_bounds = array<i64: 2, 3>, scalar_prefetch = 0 : i64, scratch_operands = 0 : i64, tpu.core_type = #tpu.core_type<tc>, window_params = [{transform_indices = @transform_0, window_bounds = array<i64: 1, 128, 128>}, {transform_indices = @transform_1, window_bounds = array<i64: 1, 8, 128>}, {transform_indices = @transform_2, window_bounds = array<i64: 1, 8, 128>}, {pipeline_mode = #tpu.pipeline_mode<synchronous>, transform_indices = @transform_3, window_bounds = array<i64: 8, 128>}, {pipeline_mode = #tpu.pipeline_mode<synchronous>, transform_indices = @transform_4, window_bounds = array<i64: 8, 128>}, {pipeline_mode = #tpu.pipeline_mode<synchronous>, transform_indices = @transform_5, window_bounds = array<i64: 128, 256>}, {pipeline_mode = #tpu.pipeline_mode<synchronous>, transform_indices = @transform_6, window_bounds = array<i64: 1, 256>}, {pipeline_mode = #tpu.pipeline_mode<synchronous>, transform_indices = @transform_7, window_bounds = array<i64: 256, 128>}, {transform_indices = @transform_8, window_bounds = array<i64: 1, 128, 128>}]} {
    %c0 = arith.constant 0 : index
    %c0_0 = arith.constant 0 : index
    %c0_1 = arith.constant 0 : index
    %0 = vector.load %arg2[%c0, %c0_0, %c0_1] : memref<1x128x128xf32, #tpu.memory_space<vmem>>, vector<1x128x128xf32>
    %1 = vector.shape_cast %0 : vector<1x128x128xf32> to vector<128x128xf32>
    %c0_2 = arith.constant 0 : index
    %c0_3 = arith.constant 0 : index
    %c0_4 = arith.constant 0 : index
    %2 = vector.load %arg3[%c0_2, %c0_3, %c0_4] : memref<1x8x128xf32, #tpu.memory_space<vmem>>, vector<1x8x128xf32>
    %3 = vector.shape_cast %2 : vector<1x8x128xf32> to vector<8x128xf32>
    %c0_5 = arith.constant 0 : index
    %c0_6 = arith.constant 0 : index
    %c0_7 = arith.constant 0 : index
    %4 = vector.load %arg4[%c0_5, %c0_6, %c0_7] : memref<1x8x128xf32, #tpu.memory_space<vmem>>, vector<1x8x128xf32>
    %5 = vector.shape_cast %4 : vector<1x8x128xf32> to vector<8x128xf32>
    %c0_i32 = arith.constant 0 : i32
    %6 = arith.cmpi sgt, %arg1, %c0_i32 : i32
    %cst = arith.constant 1.000000e+00 : f32
    %cst_8 = arith.constant 0.000000e+00 : f32
    %7 = arith.select %6, %cst, %cst_8 : f32
    %8 = vector.broadcast %7 : f32 to vector<8x128xf32>
    %9 = arith.mulf %3, %8 : vector<8x128xf32>
    %c2_i32 = arith.constant 2 : i32
    %10 = arith.cmpi slt, %arg1, %c2_i32 : i32
    %cst_9 = arith.constant 1.000000e+00 : f32
    %cst_10 = arith.constant 0.000000e+00 : f32
    %11 = arith.select %10, %cst_9, %cst_10 : f32
    %12 = vector.broadcast %11 : f32 to vector<8x128xf32>
    %13 = arith.mulf %5, %12 : vector<8x128xf32>
    %c0_11 = arith.constant 0 : index
    %c0_12 = arith.constant 0 : index
    %14 = vector.load %arg6[%c0_11, %c0_12] : memref<8x128xf32, #tpu.memory_space<vmem>>, vector<8x128xf32>
    %15 = vector.extract_strided_slice %14 {offsets = [0, 0], sizes = [1, 128], strides = [1, 1]} : vector<8x128xf32> to vector<1x128xf32>
    %16 = vector.shape_cast %15 : vector<1x128xf32> to vector<128xf32>
    %17 = vector.shape_cast %16 : vector<128xf32> to vector<1x128xf32>
    %18 = vector.extract_strided_slice %14 {offsets = [1, 0], sizes = [1, 128], strides = [1, 1]} : vector<8x128xf32> to vector<1x128xf32>
    %19 = vector.shape_cast %18 : vector<1x128xf32> to vector<128xf32>
    %20 = vector.shape_cast %19 : vector<128xf32> to vector<1x128xf32>
    %21 = vector.extract_strided_slice %14 {offsets = [2, 0], sizes = [1, 128], strides = [1, 1]} : vector<8x128xf32> to vector<1x128xf32>
    %22 = vector.shape_cast %21 : vector<1x128xf32> to vector<128xf32>
    %23 = vector.shape_cast %22 : vector<128xf32> to vector<1x128xf32>
    %24 = vector.extract_strided_slice %14 {offsets = [3, 0], sizes = [1, 128], strides = [1, 1]} : vector<8x128xf32> to vector<1x128xf32>
    %25 = vector.shape_cast %24 : vector<1x128xf32> to vector<128xf32>
    %26 = vector.shape_cast %25 : vector<128xf32> to vector<1x128xf32>
    %27 = vector.extract_strided_slice %14 {offsets = [4, 0], sizes = [1, 128], strides = [1, 1]} : vector<8x128xf32> to vector<1x128xf32>
    %28 = vector.shape_cast %27 : vector<1x128xf32> to vector<128xf32>
    %29 = vector.shape_cast %28 : vector<128xf32> to vector<1x128xf32>
    %30 = tpu.concatenate %9, %1, %13 in 0 : vector<8x128xf32>, vector<128x128xf32>, vector<8x128xf32> -> vector<144x128xf32>
    %c0_13 = arith.constant 0 : index
    %c0_14 = arith.constant 0 : index
    %31 = vector.load %arg5[%c0_13, %c0_14] : memref<8x128xf32, #tpu.memory_space<vmem>>, vector<8x128xf32>
    %cst_15 = arith.constant 0.000000e+00 : f32
    %32 = vector.broadcast %cst_15 : f32 to vector<128x128xf32>
    %c139_i32 = arith.constant 139 : i32
    %33 = tpu.dynamic_rotate %30 by %c139_i32 dim 0 : vector<144x128xf32>, i32 -> vector<144x128xf32>
    %34 = vector.extract_strided_slice %33 {offsets = [0, 0], sizes = [128, 128], strides = [1, 1]} : vector<144x128xf32> to vector<128x128xf32>
    %35 = vector.extract_strided_slice %31 {offsets = [0, 0], sizes = [1, 128], strides = [1, 1]} : vector<8x128xf32> to vector<1x128xf32>
    %36 = vector.shape_cast %35 : vector<1x128xf32> to vector<128xf32>
    %37 = vector.shape_cast %36 : vector<128xf32> to vector<1x128xf32>
    %38 = vector.broadcast %37 : vector<1x128xf32> to vector<128x128xf32>
    %39 = arith.mulf %34, %38 : vector<128x128xf32>
    %40 = arith.addf %32, %39 : vector<128x128xf32>
    %c138_i32 = arith.constant 138 : i32
    %41 = tpu.dynamic_rotate %30 by %c138_i32 dim 0 : vector<144x128xf32>, i32 -> vector<144x128xf32>
    %42 = vector.extract_strided_slice %41 {offsets = [0, 0], sizes = [128, 128], strides = [1, 1]} : vector<144x128xf32> to vector<128x128xf32>
    %43 = vector.extract_strided_slice %31 {offsets = [1, 0], sizes = [1, 128], strides = [1, 1]} : vector<8x128xf32> to vector<1x128xf32>
    %44 = vector.shape_cast %43 : vector<1x128xf32> to vector<128xf32>
    %45 = vector.shape_cast %44 : vector<128xf32> to vector<1x128xf32>
    %46 = vector.broadcast %45 : vector<1x128xf32> to vector<128x128xf32>
    %47 = arith.mulf %42, %46 : vector<128x128xf32>
    %48 = arith.addf %40, %47 : vector<128x128xf32>
    %c137_i32 = arith.constant 137 : i32
    %49 = tpu.dynamic_rotate %30 by %c137_i32 dim 0 : vector<144x128xf32>, i32 -> vector<144x128xf32>
    %50 = vector.extract_strided_slice %49 {offsets = [0, 0], sizes = [128, 128], strides = [1, 1]} : vector<144x128xf32> to vector<128x128xf32>
    %51 = vector.extract_strided_slice %31 {offsets = [2, 0], sizes = [1, 128], strides = [1, 1]} : vector<8x128xf32> to vector<1x128xf32>
    %52 = vector.shape_cast %51 : vector<1x128xf32> to vector<128xf32>
    %53 = vector.shape_cast %52 : vector<128xf32> to vector<1x128xf32>
    %54 = vector.broadcast %53 : vector<1x128xf32> to vector<128x128xf32>
    %55 = arith.mulf %50, %54 : vector<128x128xf32>
    %56 = arith.addf %48, %55 : vector<128x128xf32>
    %57 = vector.extract_strided_slice %30 {offsets = [8, 0], sizes = [128, 128], strides = [1, 1]} : vector<144x128xf32> to vector<128x128xf32>
    %58 = vector.extract_strided_slice %31 {offsets = [3, 0], sizes = [1, 128], strides = [1, 1]} : vector<8x128xf32> to vector<1x128xf32>
    %59 = vector.shape_cast %58 : vector<1x128xf32> to vector<128xf32>
    %60 = vector.shape_cast %59 : vector<128xf32> to vector<1x128xf32>
    %61 = vector.broadcast %60 : vector<1x128xf32> to vector<128x128xf32>
    %62 = arith.mulf %57, %61 : vector<128x128xf32>
    %63 = arith.addf %56, %62 : vector<128x128xf32>
    %c135_i32 = arith.constant 135 : i32
    %64 = tpu.dynamic_rotate %30 by %c135_i32 dim 0 : vector<144x128xf32>, i32 -> vector<144x128xf32>
    %65 = vector.extract_strided_slice %64 {offsets = [0, 0], sizes = [128, 128], strides = [1, 1]} : vector<144x128xf32> to vector<128x128xf32>
    %66 = vector.extract_strided_slice %31 {offsets = [4, 0], sizes = [1, 128], strides = [1, 1]} : vector<8x128xf32> to vector<1x128xf32>
    %67 = vector.shape_cast %66 : vector<1x128xf32> to vector<128xf32>
    %68 = vector.shape_cast %67 : vector<128xf32> to vector<1x128xf32>
    %69 = vector.broadcast %68 : vector<1x128xf32> to vector<128x128xf32>
    %70 = arith.mulf %65, %69 : vector<128x128xf32>
    %71 = arith.addf %63, %70 : vector<128x128xf32>
    %c134_i32 = arith.constant 134 : i32
    %72 = tpu.dynamic_rotate %30 by %c134_i32 dim 0 : vector<144x128xf32>, i32 -> vector<144x128xf32>
    %73 = vector.extract_strided_slice %72 {offsets = [0, 0], sizes = [128, 128], strides = [1, 1]} : vector<144x128xf32> to vector<128x128xf32>
    %74 = vector.extract_strided_slice %31 {offsets = [5, 0], sizes = [1, 128], strides = [1, 1]} : vector<8x128xf32> to vector<1x128xf32>
    %75 = vector.shape_cast %74 : vector<1x128xf32> to vector<128xf32>
    %76 = vector.shape_cast %75 : vector<128xf32> to vector<1x128xf32>
    %77 = vector.broadcast %76 : vector<1x128xf32> to vector<128x128xf32>
    %78 = arith.mulf %73, %77 : vector<128x128xf32>
    %79 = arith.addf %71, %78 : vector<128x128xf32>
    %c133_i32 = arith.constant 133 : i32
    %80 = tpu.dynamic_rotate %30 by %c133_i32 dim 0 : vector<144x128xf32>, i32 -> vector<144x128xf32>
    %81 = vector.extract_strided_slice %80 {offsets = [0, 0], sizes = [128, 128], strides = [1, 1]} : vector<144x128xf32> to vector<128x128xf32>
    %82 = vector.extract_strided_slice %31 {offsets = [6, 0], sizes = [1, 128], strides = [1, 1]} : vector<8x128xf32> to vector<1x128xf32>
    %83 = vector.shape_cast %82 : vector<1x128xf32> to vector<128xf32>
    %84 = vector.shape_cast %83 : vector<128xf32> to vector<1x128xf32>
    %85 = vector.broadcast %84 : vector<1x128xf32> to vector<128x128xf32>
    %86 = arith.mulf %81, %85 : vector<128x128xf32>
    %87 = arith.addf %79, %86 : vector<128x128xf32>
    %88 = vector.broadcast %17 : vector<1x128xf32> to vector<128x128xf32>
    %89 = arith.addf %87, %88 : vector<128x128xf32>
    %cst_16 = arith.constant dense<0.000000e+00> : vector<128xf32>
    %90 = vector.multi_reduction <add>, %89, %cst_16 [1] : vector<128x128xf32> to vector<128xf32>
    %91 = vector.shape_cast %90 : vector<128xf32> to vector<128x1xf32>
    %cst_17 = arith.constant 1.280000e+02 : f32
    %92 = vector.broadcast %cst_17 : f32 to vector<128x1xf32>
    %93 = arith.divf %91, %92 : vector<128x1xf32>
    %94 = arith.mulf %89, %89 : vector<128x128xf32>
    %cst_18 = arith.constant dense<0.000000e+00> : vector<128xf32>
    %95 = vector.multi_reduction <add>, %94, %cst_18 [1] : vector<128x128xf32> to vector<128xf32>
    %96 = vector.shape_cast %95 : vector<128xf32> to vector<128x1xf32>
    %cst_19 = arith.constant 1.280000e+02 : f32
    %97 = vector.broadcast %cst_19 : f32 to vector<128x1xf32>
    %98 = arith.divf %96, %97 : vector<128x1xf32>
    %99 = arith.mulf %93, %93 : vector<128x1xf32>
    %100 = arith.subf %98, %99 : vector<128x1xf32>
    %101 = vector.broadcast %93 : vector<128x1xf32> to vector<128x128xf32>
    %102 = arith.subf %89, %101 : vector<128x128xf32>
    %cst_20 = arith.constant 9.99999974E-6 : f32
    %103 = vector.broadcast %cst_20 : f32 to vector<128x1xf32>
    %104 = arith.addf %100, %103 : vector<128x1xf32>
    %105 = math.rsqrt %104 : vector<128x1xf32>
    %106 = vector.broadcast %105 : vector<128x1xf32> to vector<128x128xf32>
    %107 = arith.mulf %102, %106 : vector<128x128xf32>
    %108 = vector.broadcast %20 : vector<1x128xf32> to vector<128x128xf32>
    %109 = arith.mulf %107, %108 : vector<128x128xf32>
    %110 = vector.broadcast %23 : vector<1x128xf32> to vector<128x128xf32>
    %111 = arith.addf %109, %110 : vector<128x128xf32>
    %112 = arith.truncf %111 : vector<128x128xf32> to vector<128x128xbf16>
    %c0_21 = arith.constant 0 : index
    %c0_22 = arith.constant 0 : index
    %113 = vector.load %arg7[%c0_21, %c0_22] : memref<128x256xbf16, #tpu.memory_space<vmem>>, vector<128x256xbf16>
    %cst_23 = arith.constant dense<0.000000e+00> : vector<128x256xf32>
    %114 = tpu.matmul %112, %113, %cst_23 {dimension_numbers = #tpu.dot_dimension_numbers<[1], [0], [0], [1], [0, 0, 1, 1], [], []>} : vector<128x128xbf16>, vector<128x256xbf16>, vector<128x256xf32> -> vector<128x256xf32>
    %c0_24 = arith.constant 0 : index
    %c0_25 = arith.constant 0 : index
    %115 = vector.load %arg8[%c0_24, %c0_25] : memref<1x256xf32, #tpu.memory_space<vmem>>, vector<1x256xf32>
    %116 = vector.shape_cast %115 : vector<1x256xf32> to vector<256xf32>
    %117 = vector.shape_cast %116 : vector<256xf32> to vector<1x256xf32>
    %118 = vector.broadcast %117 : vector<1x256xf32> to vector<128x256xf32>
    %119 = arith.addf %114, %118 : vector<128x256xf32>
    %cst_26 = arith.constant 5.000000e-01 : f32
    %120 = vector.broadcast %cst_26 : f32 to vector<128x256xf32>
    %121 = arith.mulf %120, %119 : vector<128x256xf32>
    %122 = arith.mulf %119, %119 : vector<128x256xf32>
    %123 = arith.mulf %122, %119 : vector<128x256xf32>
    %cst_27 = arith.constant 4.471500e-02 : f32
    %124 = vector.broadcast %cst_27 : f32 to vector<128x256xf32>
    %125 = arith.mulf %124, %123 : vector<128x256xf32>
    %126 = arith.addf %119, %125 : vector<128x256xf32>
    %cst_28 = arith.constant 0.797884583 : f32
    %127 = vector.broadcast %cst_28 : f32 to vector<128x256xf32>
    %128 = arith.mulf %127, %126 : vector<128x256xf32>
    %129 = math.tanh %128 : vector<128x256xf32>
    %cst_29 = arith.constant 1.000000e+00 : f32
    %130 = vector.broadcast %cst_29 : f32 to vector<128x256xf32>
    %131 = arith.addf %130, %129 : vector<128x256xf32>
    %132 = arith.mulf %121, %131 : vector<128x256xf32>
    %133 = arith.truncf %132 : vector<128x256xf32> to vector<128x256xbf16>
    %c0_30 = arith.constant 0 : index
    %c0_31 = arith.constant 0 : index
    %134 = vector.load %arg9[%c0_30, %c0_31] : memref<256x128xbf16, #tpu.memory_space<vmem>>, vector<256x128xbf16>
    %cst_32 = arith.constant dense<0.000000e+00> : vector<128x128xf32>
    %135 = tpu.matmul %133, %134, %cst_32 {dimension_numbers = #tpu.dot_dimension_numbers<[1], [0], [0], [1], [0, 0, 1, 1], [], []>} : vector<128x256xbf16>, vector<256x128xbf16>, vector<128x128xf32> -> vector<128x128xf32>
    %136 = vector.broadcast %26 : vector<1x128xf32> to vector<128x128xf32>
    %137 = arith.addf %135, %136 : vector<128x128xf32>
    %138 = vector.broadcast %29 : vector<1x128xf32> to vector<128x128xf32>
    %139 = arith.mulf %138, %137 : vector<128x128xf32>
    %140 = arith.addf %1, %139 : vector<128x128xf32>
    %c0_33 = arith.constant 0 : index
    %c0_34 = arith.constant 0 : index
    %c0_35 = arith.constant 0 : index
    %141 = vector.load %arg10[%c0_33, %c0_34, %c0_35] : memref<1x128x128xf32, #tpu.memory_space<vmem>>, vector<1x128x128xf32>
    %142 = vector.shape_cast %141 : vector<1x128x128xf32> to vector<128x128xf32>
    %143 = vector.shape_cast %140 : vector<128x128xf32> to vector<1x128x128xf32>
    tpu.vector_store %arg10[%c0_33, %c0_34, %c0_35], %143 {strides = array<i32>} : memref<1x128x128xf32, #tpu.memory_space<vmem>>, vector<1x128x128xf32>,
    return
  }
  func.func @transform_0(%arg0: i32, %arg1: i32) -> (i32, i32, i32) {
    %c0_i32 = arith.constant 0 : i32
    %c0_i32_0 = arith.constant 0 : i32
    return %arg0, %arg1, %c0_i32 : i32, i32, i32
  }
  func.func @transform_1(%arg0: i32, %arg1: i32) -> (i32, i32, i32) {
    %c16_i32 = arith.constant 16 : i32
    %0 = arith.muli %arg1, %c16_i32 : i32
    %c1_i32 = arith.constant 1 : i32
    %1 = arith.subi %0, %c1_i32 : i32
    %c0_i32 = arith.constant 0 : i32
    %2 = arith.maxsi %1, %c0_i32 : i32
    %c0_i32_0 = arith.constant 0 : i32
    %c0_i32_1 = arith.constant 0 : i32
    return %arg0, %2, %c0_i32_0 : i32, i32, i32
  }
  func.func @transform_2(%arg0: i32, %arg1: i32) -> (i32, i32, i32) {
    %c1_i32 = arith.constant 1 : i32
    %0 = arith.addi %arg1, %c1_i32 : i32
    %c16_i32 = arith.constant 16 : i32
    %1 = arith.muli %0, %c16_i32 : i32
    %c47_i32 = arith.constant 47 : i32
    %2 = arith.minsi %1, %c47_i32 : i32
    %c0_i32 = arith.constant 0 : i32
    %c0_i32_0 = arith.constant 0 : i32
    return %arg0, %2, %c0_i32 : i32, i32, i32
  }
  func.func @transform_3(%arg0: i32, %arg1: i32) -> (i32, i32) {
    %c0_i32 = arith.constant 0 : i32
    %c0_i32_0 = arith.constant 0 : i32
    %c0_i32_1 = arith.constant 0 : i32
    return %c0_i32, %c0_i32_0 : i32, i32
  }
  func.func @transform_4(%arg0: i32, %arg1: i32) -> (i32, i32) {
    %c0_i32 = arith.constant 0 : i32
    %c0_i32_0 = arith.constant 0 : i32
    %c0_i32_1 = arith.constant 0 : i32
    return %c0_i32, %c0_i32_0 : i32, i32
  }
  func.func @transform_5(%arg0: i32, %arg1: i32) -> (i32, i32) {
    %c0_i32 = arith.constant 0 : i32
    %c0_i32_0 = arith.constant 0 : i32
    %c0_i32_1 = arith.constant 0 : i32
    return %c0_i32, %c0_i32_0 : i32, i32
  }
  func.func @transform_6(%arg0: i32, %arg1: i32) -> (i32, i32) {
    %c0_i32 = arith.constant 0 : i32
    %c0_i32_0 = arith.constant 0 : i32
    %c0_i32_1 = arith.constant 0 : i32
    return %c0_i32, %c0_i32_0 : i32, i32
  }
  func.func @transform_7(%arg0: i32, %arg1: i32) -> (i32, i32) {
    %c0_i32 = arith.constant 0 : i32
    %c0_i32_0 = arith.constant 0 : i32
    %c0_i32_1 = arith.constant 0 : i32
    return %c0_i32, %c0_i32_0 : i32, i32
  }
  func.func @transform_8(%arg0: i32, %arg1: i32) -> (i32, i32, i32) {
    %c0_i32 = arith.constant 0 : i32
    %c0_i32_0 = arith.constant 0 : i32
    return %arg0, %arg1, %c0_i32 : i32, i32, i32
  }
}

</mosaic_0001>

<bundles_post_ra>
// kernel: convnext_layer.1
= control target key start
LH: loop header
LB: loop body
LE: loop exit
PB: predicated region body
PF: predicated region fallthrough
CT: control target
= control target key end

     0   :  { %s2575_s27 = smov 0   ;;  %s2577_s28 = smov 0   ;;  %s3942_s0 = inlined_call_operand.vmem [shape: f32[2,384,128], index: 0, kind: input, shape index: {}, may-alias: {0,1,2}]   ;;  %s3943_s1 = inlined_call_operand.vmem [shape: f32[2,384,128], index: 1, kind: input, shape index: {}, may-alias: {0,1,2}]   ;;  %s3944_s2 = inlined_call_operand.vmem [shape: f32[2,384,128], index: 2, kind: input, shape index: {}, may-alias: {0,1,2}]   ;;  %s3945_s3 = inlined_call_operand.vmem [shape: f32[8,128], index: 3, kind: input, shape index: {}]   ;;  %s3946_s4 = inlined_call_operand.vmem [shape: f32[8,128], index: 4, kind: input, shape index: {}]   ;;  %s3947_s5 = inlined_call_operand.vmem [shape: bf16[128,256], index: 5, kind: input, shape index: {}]   ;;  %s3948_s6 = inlined_call_operand.vmem [shape: f32[1,256], index: 6, kind: input, shape index: {}]   ;;  %s3949_s7 = inlined_call_operand.vmem [shape: bf16[256,128], index: 7, kind: input, shape index: {}]   ;;  %s3950_s8 = inlined_call_operand.vmem [shape: f32[2,384,128], index: 8, kind: output, shape index: {}]  }
   0x1   :  { %s2579_s29 = smov 0   ;;  %s2581_s30 = smov 0  }
   0x2   :  { %s2583_s9 = smov 0  }
   0x3 LB: > { %s27_s10 = sadd.s32 1, %s2519_s29  ;;  %s30_s11 = sadd.s32 1, %s2523_s30  ;;  %s2527_s9 = sphi %s2583_s9, %s18_s9   ;;  %s2523_s30 = sphi %s2581_s30, %s3955_s30   ;;  %s2519_s29 = sphi %s2579_s29, %s3954_s29   ;;  %s2515_s28 = sphi %s2577_s28, %s3953_s28   ;;  %s2511_s27 = sphi %s2575_s27, %s3952_s27  }
   0x4   : > { %p28_p0 = scmp.ge.s32.totalorder %s27_s10, 3  ;;  %p2169_p1 = scmp.ge.s32.totalorder %s2527_s9, 1 }
   0x5   : > { %p345_p2 = scmp.lt.s32.totalorder %s2527_s9, 7 }
   0x6   : > { %s3957_s10 = smov (%p28_p0, %s27_s10), 0  ;;  %s3959_s11 = smov (!%p28_p0, %s30_s11), %s2523_s30 }
   0x7   : > { %p346_p3 = pnand %p2169_p1, %p345_p2  ;;  %p32_p4 = scmp.ge.s32.totalorder %s3959_s11, 2 }
   0x8   : > { %s2608_s12 = sshll.u32 (!%p346_p3), %s2511_s27, 4  ;;  %p412_p5 = scmp.lt.s32.totalorder (!%p346_p3), %s2515_s28, 1  ;;  %v509_v0 = vlaneseq (!%p346_p3)  ;;  %v490_v2 = vld [vmem:[%s3946_s4] sm:$0xff] (!%p346_p3) }
   0x9   : > { %s3961_s11 = smov (%p32_p4, %s3959_s11), 0  ;;  %349 = sbr.rel (%p346_p3) target bundleno = 784 (0x310), region = 52 }
   0xa   : > { %p414_p6 = scmp.lt.s32.totalorder (!%p346_p3), %s2608_s12, 47  ;;  %s2612_s13 = sadd.s32 (!%p346_p3), 4294967295, %s2608_s12  ;;  %v2614_v1 = vshrl.u32 (!%p346_p3), %v509_v0, 7  ;;  %v491_v3 = vld [vmem:[%s3945_s3] sm:$0xff] (!%p346_p3) }
   0xb   : > { %p423_p7 = scmp.gt.s32.totalorder (!%p346_p3), %s2612_s13, 0  ;;  %p482_p8 = scmp.gt.s32.totalorder (!%p346_p3), %s2511_s27, 0 }
   0xc   : > { %v2626_v4 = vsub.s32 (!%p346_p3), 0, %v2614_v1  ;;  %v2629_v5 = vsub.s32 (!%p346_p3), 1, %v2614_v1  ;;  %vm511_vm0 = vcmp.lt.s32.totalorder (!%p346_p3), %v2614_v1, 3  ;;  %vm581_vm1 = vcmp.lt.s32.totalorder (!%p346_p3), %v2614_v1, 2  ;;  %s2228_s21 = sadd.s32 (!%p346_p3), 16, %s2608_s12  ;;  %p2174_p9 = scmp.lt.s32.totalorder (!%p346_p3), %s2612_s13, 47 }
   0xd   : > { %v670_v6 = vsub.s32 (!%p346_p3), 2, %v2614_v1  ;;  %v706_v7 = vsub.s32 (!%p346_p3), 3, %v2614_v1  ;;  %vm651_vm2 = vcmp.lt.s32.totalorder (!%p346_p3), %v2614_v1, 1  ;;  %v776_v8 = vsub.s32 (!%p346_p3), 4, %v2614_v1  ;;  %p2670_p10 = scmp.lt.s32.totalorder (!%p346_p3), %s2228_s21, 47  ;;  %p486_p11 = scmp.lt.s32.totalorder (!%p346_p3), %s2511_s27, 2 }
   0xe   : > { %v2644_v9 = vrot.slane (!%p346_p3), %v491_v3, %v2626_v4  ;;  %vm757_vm3 = vcmp.lt.s32.totalorder (!%p346_p3), %v2614_v1, 7  ;;  %v846_v11 = vsub.s32 (!%p346_p3), 5, %v2614_v1  ;;  %v2660_v12 = vrot.slane (!%p346_p3), %v491_v3, %v2629_v5 }
   0xf   : > { %v2648_v10 = vrot.slane (!%p346_p3), %v491_v3, %v706_v7  ;;  %v2664_v13 = vrot.slane (!%p346_p3), %v491_v3, %v670_v6  ;;  %vm827_vm4 = vcmp.lt.s32.totalorder (!%p346_p3), %v2614_v1, 6  ;;  %vm897_vm5 = vcmp.lt.s32.totalorder (!%p346_p3), %v2614_v1, 5 }
  0x10   : > { %s3963_s28 = smov (!%p412_p5, %s2515_s28), 1  ;;  %v2685_v17 = vrot.slane %v491_v3, %v776_v8  ;;  %v2687_v18 = vrot.slane %v491_v3, %v846_v11  ;;  %v916_v19 = vsub.s32 6, %v2614_v1  ;;  %v2691_v20 = vrot.slane %v490_v2, %v2626_v4  ;;  %s3967_s21 = smov (!%p2670_p10, %s2228_s21), 47 }
  0x11   : > { %s415_s14 = scalar_select %p414_p6, %s2608_s12, 47 }
  0x12   : > { %s2617_s15 = smul.u32 48, %s3963_s28  ;;  %v2747_v44 = vrot.slane %v491_v3, %v916_v19  ;;  %s3969_s21 = smov (!%p2670_p10, %s3967_s21), 47 }
  0x13   : > { %s424_s28 = scalar_select %p423_p7, %s2612_s13, 0 }
  0x14   : > { %s417_s20 = sadd.s32 %s2617_s15, %s415_s14  ;;  %s2773_s19 = sadd.s32 %s2617_s15, %s3969_s21 }
  0x15   : > { %s2641_s22 = sshll.u32 %s417_s20, 3  ;;  %s3965_s28 = smov (!%p2174_p9, %s424_s28), 47 }
  0x16   : > { %s2657_s25 = scalar_lea.vmem %s3942_s0, %s2641_s22  ;;  %s430_s13 = sadd.s32 %s2617_s15, %s3965_s28 }
  0x17   : > { %v2675_v14 = vld [vmem:[%s2657_s25] sm:$0xff]  ;;  %v2678_v15 = vld [vmem:[%s2657_s25 + $0x8] sm:$0xff]  ;;  %v2681_v16 = vld [vmem:[%s2657_s25 + $0x10] sm:$0xff]  ;;  %s2702_s14 = scalar_select %p482_p8, 1.0, 0.0 }
  0x18   : > { %v493_v21 = vrot.slane %v2675_v14, 5  ;;  %v494_v22 = vrot.slane %v2678_v15, 5  ;;  %v565_v23 = vrot.slane %v2675_v14, 6  ;;  %v566_v24 = vrot.slane %v2678_v15, 6  ;;  %s2179_s12 = sshll.u32 %s430_s13, 3  ;;  %v2753_v45 = vld [vmem:[%s2657_s25 + $0x18] sm:$0xff] }
  0x19   : > { %v635_v25 = vrot.slane %v2675_v14, 7  ;;  %v636_v26 = vrot.slane %v2678_v15, 7  ;;  %v709_v27 = vmul.f32 %v2648_v10, %v2678_v15  ;;  %v741_v28 = vrot.slane %v2678_v15, 1  ;;  %s432_s18 = scalar_lea.vmem %s3943_s1, %s2179_s12  ;;  %s2184_s15 = sshll.u32 %s2773_s19, 3 }
  0x1a   : > { %v526_v29 = vsel %vm511_vm0, %v493_v21, %v494_v22  ;;  %v596_v30 = vsel %vm581_vm1, %v565_v23, %v566_v24  ;;  %v742_v31 = vrot.slane %v2681_v16, 1  ;;  %v811_v32 = vrot.slane %v2678_v15, 2  ;;  %v480_v48 = vld [vmem:[%s432_s18] sm:$0xff]  ;;  %s448_s24 = scalar_lea.vmem %s3944_s2, %s2184_s15 }
  0x1b   : > { %v533_v33 = vmul.f32 %v2644_v9, %v526_v29  ;;  %v603_v34 = vmul.f32 %v2660_v12, %v596_v30  ;;  %v666_v35 = vsel %vm651_vm2, %v635_v25, %v636_v26  ;;  %v812_v36 = vrot.slane %v2681_v16, 2  ;;  %s487_s26 = scalar_select %p486_p11, 1.0, 0.0 }
  0x1c   : > { %v673_v37 = vmul.f32 %v2664_v13, %v666_v35  ;;  %v772_v38 = vsel %vm757_vm3, %v741_v28, %v742_v31  ;;  %v881_v39 = vrot.slane %v2678_v15, 3  ;;  %v882_v40 = vrot.slane %v2681_v16, 3 }
  0x1d   : > { %v619_v41 = vadd.f32 %v603_v34, %v533_v33  ;;  %v779_v42 = vmul.f32 %v2685_v17, %v772_v38  ;;  %v842_v43 = vsel %vm827_vm4, %v811_v32, %v812_v36  ;;  %v484_v49 = vstv %s2702_s14 }
  0x1e   : > { %v849_v46 = vmul.f32 %v2687_v18, %v842_v43  ;;  %v912_v47 = vsel %vm897_vm5, %v881_v39, %v882_v40  ;;  %v708_v50 = vmul.f32 %v2648_v10, %v2675_v14  ;;  %v485_v53 = vmul.f32 %v484_v49, %v480_v48 }
  0x1f   : > { %v689_v51 = vadd.f32 %v673_v37, %v619_v41  ;;  %v919_v52 = vmul.f32 %v2747_v44, %v912_v47  ;;  %v740_v54 = vrot.slane %v2675_v14, 1  ;;  %v810_v55 = vrot.slane %v2675_v14, 2 }
  0x20   : > { %v880_v56 = vrot.slane %v2675_v14, 3  ;;  %v495_v57 = vrot.slane %v2681_v16, 5  ;;  %v496_v58 = vrot.slane %v2753_v45, 5  ;;  %v492_v60 = vrot.slane %v485_v53, 5 }
  0x21   : > { %v725_v59 = vadd.f32 %v709_v27, %v689_v51  ;;  %v564_v61 = vrot.slane %v485_v53, 6  ;;  %v634_v62 = vrot.slane %v485_v53, 7  ;;  %v773_v63 = vsel %vm757_vm3, %v740_v54, %v741_v28  ;;  %v2792_v28 = vld [vmem:[%s2657_s25 + $0x20] sm:$0xff] }
  0x22   : > { %v843_v0 = vsel %vm827_vm4, %v810_v55, %v811_v32  ;;  %v913_v2 = vsel %vm897_vm5, %v880_v56, %v881_v39  ;;  %v524_v3 = vsel %vm511_vm0, %v495_v57, %v496_v58  ;;  %v527_v14 = vsel %vm511_vm0, %v492_v60, %v493_v21 }
  0x23   : > { %v795_v11 = vadd.f32 %v779_v42, %v725_v59  ;;  %v597_v19 = vsel %vm581_vm1, %v564_v61, %v565_v23  ;;  %v667_v27 = vsel %vm651_vm2, %v634_v62, %v635_v25  ;;  %v532_v29 = vmul.f32 %v2644_v9, %v527_v14 }
  0x24   : > { %v602_v30 = vmul.f32 %v2660_v12, %v597_v19  ;;  %v672_v32 = vmul.f32 %v2664_v13, %v667_v27  ;;  %v778_v33 = vmul.f32 %v2685_v17, %v773_v63  ;;  %v848_v35 = vmul.f32 %v2687_v18, %v843_v0 }
  0x25   : > { %v865_v34 = vadd.f32 %v849_v46, %v795_v11  ;;  %v918_v21 = vmul.f32 %v2747_v44, %v913_v2  ;;  %v535_v23 = vmul.f32 %v2644_v9, %v524_v3  ;;  %v567_v25 = vrot.slane %v2681_v16, 6 }
  0x26   : > { %v618_v37 = vadd.f32 %v602_v30, %v532_v29  ;;  %v568_v38 = vrot.slane %v2753_v45, 6  ;;  %v637_v39 = vrot.slane %v2681_v16, 7  ;;  %v638_v42 = vrot.slane %v2753_v45, 7 }
  0x27   : > { %v935_v41 = vadd.f32 %v919_v52, %v865_v34  ;;  %v711_v43 = vmul.f32 %v2648_v10, %v2753_v45  ;;  %v743_v46 = vrot.slane %v2753_v45, 1  ;;  %v744_v49 = vrot.slane %v2792_v28, 1 }
  0x28   : > { %v688_v47 = vadd.f32 %v672_v32, %v618_v37  ;;  %v594_v48 = vsel %vm581_vm1, %v567_v25, %v568_v38  ;;  %v813_v51 = vrot.slane %v2753_v45, 2  ;;  %v664_v54 = vsel %vm651_vm2, %v637_v39, %v638_v42 }
  0x29   : > { %v2815_v53 = vadd.f32 %v2691_v20, %v935_v41  ;;  %v605_v52 = vmul.f32 %v2660_v12, %v594_v48  ;;  %v814_v55 = vrot.slane %v2792_v28, 2  ;;  %v675_v59 = vmul.f32 %v2664_v13, %v664_v54 }
  0x2a   : > { %v724_v56 = vadd.f32 %v708_v50, %v688_v47  ;;  %v770_v60 = vsel %vm757_vm3, %v743_v46, %v744_v49  ;;  %v883_v61 = vrot.slane %v2753_v45, 3  ;;  %v884_v11 = vrot.slane %v2792_v28, 3 }
  0x2b   : > { %v1020_v62 = vmul.f32 %v2815_v53, %v2815_v53  ;;  %v621_v63 = vadd.f32 %v605_v52, %v535_v23  ;;  %v781_v0 = vmul.f32 %v2685_v17, %v770_v60  ;;  %v840_v50 = vsel %vm827_vm4, %v813_v51, %v814_v55 }
  0x2c   : > { %v794_v2 = vadd.f32 %v778_v33, %v724_v56  ;;  %v851_v3 = vmul.f32 %v2687_v18, %v840_v50  ;;  %v525_v14 = vsel %vm511_vm0, %v494_v22, %v495_v57  ;;  %v595_v29 = vsel %vm581_vm1, %v566_v24, %v567_v25 }
  0x2d   : > { %1037 = vadd.xlane.f32.xlu1 %v1020_v62  ;;  %v691_v19 = vadd.f32 %v675_v59, %v621_v63  ;;  %v534_v27 = vmul.f32 %v2644_v9, %v525_v14  ;;  %v665_v30 = vsel %vm651_vm2, %v636_v26, %v637_v39  ;;  %v910_v22 = vsel %vm897_vm5, %v883_v61, %v884_v11  ;;  %v2865_v26 = vld [vmem:[%s2657_s25 + $0x28] sm:$0xff]  ;;  %v2890_v59 = vld [vmem:[%s2657_s25 + $0x30] sm:$0xff] }
  0x2e   : > { %v864_v32 = vadd.f32 %v848_v35, %v794_v2  ;;  %v604_v57 = vmul.f32 %v2660_v12, %v595_v29  ;;  %v674_v33 = vmul.f32 %v2664_v13, %v665_v30  ;;  %v921_v23 = vmul.f32 %v2747_v44, %v910_v22 }
  0x2f   : > { %v727_v34 = vadd.f32 %v711_v43, %v691_v19  ;;  %v710_v24 = vmul.f32 %v2648_v10, %v2681_v16  ;;  %v771_v15 = vsel %vm757_vm3, %v742_v31, %v743_v46  ;;  %v841_v39 = vsel %vm827_vm4, %v812_v36, %v813_v51 }
  0x30   : > { %v934_v35 = vadd.f32 %v918_v21, %v864_v32  ;;  %v620_v37 = vadd.f32 %v604_v57, %v534_v27  ;;  %v780_v25 = vmul.f32 %v2685_v17, %v771_v15  ;;  %v850_v43 = vmul.f32 %v2687_v18, %v841_v39 }
  0x31   : > { %v797_v41 = vadd.f32 %v781_v0, %v727_v34  ;;  %v911_v31 = vsel %vm897_vm5, %v882_v40, %v883_v61  ;;  %v497_v46 = vrot.slane %v2792_v28, 5  ;;  %v498_v52 = vrot.slane %v2865_v26, 5 }
  0x32   : > { %v2879_v21 = vadd.f32 %v2691_v20, %v934_v35  ;;  %v690_v47 = vadd.f32 %v674_v33, %v620_v37  ;;  %v920_v48 = vmul.f32 %v2747_v44, %v911_v31  ;;  %v569_v51 = vrot.slane %v2792_v28, 6 }
  0x33   : > { %v867_v36 = vadd.f32 %v851_v3, %v797_v41  ;;  %v570_v54 = vrot.slane %v2865_v26, 6  ;;  %v639_v16 = vrot.slane %v2792_v28, 7  ;;  %v522_v60 = vsel %vm511_vm0, %v497_v46, %v498_v52 }
  0x34   : > { %970 = vadd.xlane.f32.xlu0 %v2879_v21  ;;  %v1019_v40 = vmul.f32 %v2879_v21, %v2879_v21  ;;  %v726_v56 = vadd.f32 %v710_v24, %v690_v47  ;;  %v640_v61 = vrot.slane %v2865_v26, 7  ;;  %v537_v63 = vmul.f32 %v2644_v9, %v522_v60  ;;  %v2335_v47 = vld [vmem:[%s3947_s5 + $0x4] ss:$8 sps:$4 sm:$0xff]  }
  0x35   : > { %v937_v62 = vadd.f32 %v921_v23, %v867_v36  ;;  %v592_v0 = vsel %vm581_vm1, %v569_v51, %v570_v54  ;;  %v713_v50 = vmul.f32 %v2648_v10, %v2865_v26  ;;  %v745_v19 = vrot.slane %v2865_v26, 1  ;;  %1335 = vmatprep.subr.bf16.mxu0 %v2335_v47  ;;  %v2337_v47 = vld [vmem:[%s3947_s5] ss:$8 sps:$4 sm:$0xff]  }
  0x36   : > { %1035 = vadd.xlane.f32.xlu1 %v1019_v40  ;;  %v796_v2 = vadd.f32 %v780_v25, %v726_v56  ;;  %v607_v3 = vmul.f32 %v2660_v12, %v592_v0  ;;  %v662_v14 = vsel %vm651_vm2, %v639_v16, %v640_v61  ;;  %v746_v30 = vrot.slane %v2890_v59, 1  ;;  %1336 = vmatpush1.bf16.msra.mxu0 %v2337_v47 }
  0x37   : > { %v2911_v27 = vadd.f32 %v2691_v20, %v937_v62  ;;  %v677_v29 = vmul.f32 %v2664_v13, %v662_v14  ;;  %v815_v32 = vrot.slane %v2865_v26, 2  ;;  %v816_v33 = vrot.slane %v2890_v59, 2 }
  0x38   : > { %972 = vadd.xlane.f32.xlu0 %v2815_v53  ;;  %v866_v22 = vadd.f32 %v850_v43, %v796_v2  ;;  %v623_v57 = vadd.f32 %v607_v3, %v537_v63  ;;  %v885_v34 = vrot.slane %v2865_v26, 3  ;;  %v768_v24 = vsel %vm757_vm3, %v745_v19, %v746_v30  ;;  %v2969_v63 = vld [vmem:[%s2657_s25 + $0x38] sm:$0xff] }
  0x39   : > { %v1022_v23 = vmul.f32 %v2911_v27, %v2911_v27  ;;  %v886_v15 = vrot.slane %v2890_v59, 3  ;;  %v523_v35 = vsel %vm511_vm0, %v496_v58, %v497_v46  ;;  %v783_v39 = vmul.f32 %v2685_v17, %v768_v24 }
  0x3a   : > { %976 = vadd.xlane.f32.xlu1 %v2911_v27  ;;  %v936_v37 = vadd.f32 %v920_v48, %v866_v22  ;;  %v693_v25 = vadd.f32 %v677_v29, %v623_v57  ;;  %v838_v41 = vsel %vm827_vm4, %v815_v32, %v816_v33  ;;  %v536_v58 = vmul.f32 %v2644_v9, %v523_v35  ;;  %v2986_v22 = vld [vmem:[%s2657_s25 + $0x40] sm:$0xff] }
  0x3b   : > { %v853_v43 = vmul.f32 %v2687_v18, %v838_v41  ;;  %v908_v31 = vsel %vm897_vm5, %v885_v34, %v886_v15  ;;  %v593_v46 = vsel %vm581_vm1, %v568_v38, %v569_v51  ;;  %v663_v60 = vsel %vm651_vm2, %v638_v42, %v639_v16 }
  0x3c   : > { %v2950_v48 = vadd.f32 %v2691_v20, %v936_v37  ;;  %v729_v36 = vadd.f32 %v713_v50, %v693_v25  ;;  %v923_v40 = vmul.f32 %v2747_v44, %v908_v31  ;;  %v606_v56 = vmul.f32 %v2660_v12, %v593_v46 }
  0x3d   : > { %v712_v38 = vmul.f32 %v2648_v10, %v2792_v28  ;;  %v769_v51 = vsel %vm757_vm3, %v744_v49, %v745_v19  ;;  %v839_v62 = vsel %vm827_vm4, %v814_v55, %v815_v32  ;;  %v499_v0 = vrot.slane %v2890_v59, 5 }
  0x3e   : > { %974 = vadd.xlane.f32.xlu0 %v2950_v48  ;;  %1041 = vadd.xlane.f32.xlu1 %v1022_v23  ;;  %v1021_v45 = vmul.f32 %v2950_v48, %v2950_v48  ;;  %v799_v42 = vadd.f32 %v783_v39, %v729_v36  ;;  %v622_v16 = vadd.f32 %v606_v56, %v536_v58  ;;  %v500_v19 = vrot.slane %v2969_v63, 5 }
  0x3f   : > { %v676_v49 = vmul.f32 %v2664_v13, %v663_v60  ;;  %v782_v50 = vmul.f32 %v2685_v17, %v769_v51  ;;  %v852_v55 = vmul.f32 %v2687_v18, %v839_v62  ;;  %v909_v2 = vsel %vm897_vm5, %v884_v11, %v885_v34 }
  0x40   : > { %v869_v3 = vadd.f32 %v853_v43, %v799_v42  ;;  %v922_v14 = vmul.f32 %v2747_v44, %v909_v2  ;;  %v571_v29 = vrot.slane %v2890_v59, 6  ;;  %v572_v57 = vrot.slane %v2969_v63, 6 }
  0x41   : > { %v692_v32 = vadd.f32 %v676_v49, %v622_v16  ;;  %v641_v23 = vrot.slane %v2890_v59, 7  ;;  %v642_v24 = vrot.slane %v2969_v63, 7  ;;  %v520_v11 = vsel %vm511_vm0, %v499_v0, %v500_v19 }
  0x42   : > { %1039 = vadd.xlane.f32.xlu0 %v1021_v45  ;;  %v939_v28 = vadd.f32 %v923_v40, %v869_v3  ;;  %v715_v34 = vmul.f32 %v2648_v10, %v2969_v63  ;;  %v747_v35 = vrot.slane %v2969_v63, 1  ;;  %v539_v25 = vmul.f32 %v2644_v9, %v520_v11 }
  0x43   : > { %v728_v37 = vadd.f32 %v712_v38, %v692_v32  ;;  %v590_v39 = vsel %vm581_vm1, %v571_v29, %v572_v57  ;;  %v660_v41 = vsel %vm651_vm2, %v641_v23, %v642_v24  ;;  %v748_v46 = vrot.slane %v2986_v22, 1 }
  0x44   : > { %v3008_v43 = vadd.f32 %v2691_v20, %v939_v28  ;;  %v609_v31 = vmul.f32 %v2660_v12, %v590_v39  ;;  %v679_v58 = vmul.f32 %v2664_v13, %v660_v41  ;;  %v817_v40 = vrot.slane %v2969_v63, 2  ;;  %v3056_v41 = vld [vmem:[%s2657_s25 + $0x48] sm:$0xff] }
  0x45   : > { %v798_v36 = vadd.f32 %v782_v50, %v728_v37  ;;  %v818_v56 = vrot.slane %v2986_v22, 2  ;;  %v887_v60 = vrot.slane %v2969_v63, 3  ;;  %v766_v62 = vsel %vm757_vm3, %v747_v35, %v748_v46 }
  0x46   : > { %980 = vadd.xlane.f32.xlu1 %v3008_v43  ;;  %v1024_v38 = vmul.f32 %v3008_v43, %v3008_v43  ;;  %v625_v51 = vadd.f32 %v609_v31, %v539_v25  ;;  %v888_v45 = vrot.slane %v2986_v22, 3  ;;  %v785_v16 = vmul.f32 %v2685_v17, %v766_v62 }
  0x47   : > { %v868_v42 = vadd.f32 %v852_v55, %v798_v36  ;;  %v836_v49 = vsel %vm827_vm4, %v817_v40, %v818_v56  ;;  %v521_v50 = vsel %vm511_vm0, %v498_v52, %v499_v0  ;;  %v591_v37 = vsel %vm581_vm1, %v570_v54, %v571_v29  ;;  %v2338_v54 = vld [vmem:[%s3947_s5 + $0x14] ss:$8 sps:$4 sm:$0xff]  }
  0x48   : > { %v695_v2 = vadd.f32 %v679_v58, %v625_v51  ;;  %v855_v3 = vmul.f32 %v2687_v18, %v836_v49  ;;  %v906_v55 = vsel %vm897_vm5, %v887_v60, %v888_v45  ;;  %v538_v32 = vmul.f32 %v2644_v9, %v521_v50  ;;  %1337 = vmatprep.subr.bf16.mxu0 %v2338_v54 }
  0x49   : > { %v938_v28 = vadd.f32 %v922_v14, %v868_v42  ;;  %v925_v11 = vmul.f32 %v2747_v44, %v906_v55  ;;  %v661_v52 = vsel %vm651_vm2, %v640_v61, %v641_v23  ;;  %v608_v25 = vmul.f32 %v2660_v12, %v591_v37 }
  0x4a   : > { %1045 = vadd.xlane.f32.xlu1 %v1024_v38  ;;  %v731_v0 = vadd.f32 %v715_v34, %v695_v2  ;;  %v678_v39 = vmul.f32 %v2664_v13, %v661_v52  ;;  %v714_v14 = vmul.f32 %v2648_v10, %v2890_v59  ;;  %v767_v61 = vsel %vm757_vm3, %v746_v30, %v747_v35 }
  0x4b   : > { %v3062_v26 = vadd.f32 %v2691_v20, %v938_v28  ;;  %v837_v29 = vsel %vm827_vm4, %v816_v33, %v817_v40  ;;  %v907_v23 = vsel %vm897_vm5, %v886_v15, %v887_v60  ;;  %v624_v31 = vadd.f32 %v608_v25, %v538_v32  ;;  %v3085_v40 = vld [vmem:[%s2657_s25 + $0x50] sm:$0xff] }
  0x4c   : > { %v801_v34 = vadd.f32 %v785_v16, %v731_v0  ;;  %v784_v58 = vmul.f32 %v2685_v17, %v767_v61  ;;  %v854_v47 = vmul.f32 %v2687_v18, %v837_v29  ;;  %v924_v35 = vmul.f32 %v2747_v44, %v907_v23 }
  0x4d   : > { %978 = vadd.xlane.f32.xlu0 %v3062_v26  ;;  %v1023_v30 = vmul.f32 %v3062_v26, %v3062_v26  ;;  %v501_v33 = vrot.slane %v2986_v22, 5  ;;  %v502_v59 = vrot.slane %v3056_v41, 5  ;;  %v694_v15 = vadd.f32 %v678_v39, %v624_v31 }
  0x4e   : > { %v871_v36 = vadd.f32 %v855_v3, %v801_v34  ;;  %v573_v60 = vrot.slane %v2986_v22, 6  ;;  %v574_v38 = vrot.slane %v3056_v41, 6  ;;  %v643_v62 = vrot.slane %v2986_v22, 7 }
  0x4f   : > { %v518_v51 = vsel %vm511_vm0, %v501_v33, %v502_v59  ;;  %v644_v42 = vrot.slane %v3056_v41, 7  ;;  %v717_v16 = vmul.f32 %v2648_v10, %v3056_v41  ;;  %v730_v50 = vadd.f32 %v714_v14, %v694_v15 }
  0x50   : > { %v941_v49 = vadd.f32 %v925_v11, %v871_v36  ;;  %v541_v2 = vmul.f32 %v2644_v9, %v518_v51  ;;  %v588_v3 = vsel %vm581_vm1, %v573_v60, %v574_v38  ;;  %v749_v28 = vrot.slane %v3056_v41, 1 }
  0x51   : > { %1043 = vadd.xlane.f32.xlu0 %v1023_v30  ;;  %v611_v55 = vmul.f32 %v2660_v12, %v588_v3  ;;  %v658_v32 = vsel %vm651_vm2, %v643_v62, %v644_v42  ;;  %v750_v11 = vrot.slane %v3085_v40, 1  ;;  %v800_v52 = vadd.f32 %v784_v58, %v730_v50 }
  0x52   : > { %v3110_v37 = vadd.f32 %v2691_v20, %v941_v49  ;;  %v681_v0 = vmul.f32 %v2664_v13, %v658_v32  ;;  %v819_v25 = vrot.slane %v3056_v41, 2  ;;  %v820_v54 = vrot.slane %v3085_v40, 2 }
  0x53   : > { %v627_v39 = vadd.f32 %v611_v55, %v541_v2  ;;  %v764_v14 = vsel %vm757_vm3, %v749_v28, %v750_v11  ;;  %v889_v61 = vrot.slane %v3056_v41, 3  ;;  %v870_v29 = vadd.f32 %v854_v47, %v800_v52  ;;  %v3160_v55 = vld [vmem:[%s2657_s25 + $0x58] sm:$0xff] }
  0x54   : > { %984 = vadd.xlane.f32.xlu1 %v3110_v37  ;;  %v1026_v23 = vmul.f32 %v3110_v37, %v3110_v37  ;;  %v787_v34 = vmul.f32 %v2685_v17, %v764_v14  ;;  %v890_v31 = vrot.slane %v3085_v40, 3  ;;  %v834_v30 = vsel %vm827_vm4, %v819_v25, %v820_v54 }
  0x55   : > { %v697_v58 = vadd.f32 %v681_v0, %v627_v39  ;;  %v519_v36 = vsel %vm511_vm0, %v500_v19, %v501_v33  ;;  %v589_v47 = vsel %vm581_vm1, %v572_v57, %v573_v60  ;;  %v940_v15 = vadd.f32 %v924_v35, %v870_v29 }
  0x56   : > { %v857_v51 = vmul.f32 %v2687_v18, %v834_v30  ;;  %v904_v49 = vsel %vm897_vm5, %v889_v61, %v890_v31  ;;  %v540_v50 = vmul.f32 %v2644_v9, %v519_v36  ;;  %v610_v19 = vmul.f32 %v2660_v12, %v589_v47  ;;  %v3189_v36 = vld [vmem:[%s2657_s25 + $0x60] sm:$0xff] }
  0x57   : > { %v733_v2 = vadd.f32 %v717_v16, %v697_v58  ;;  %v927_v3 = vmul.f32 %v2747_v44, %v904_v49  ;;  %v659_v57 = vsel %vm651_vm2, %v642_v24, %v643_v62  ;;  %v3150_v35 = vadd.f32 %v2691_v20, %v940_v15 }
  0x58   : > { %1049 = vadd.xlane.f32.xlu1 %v1026_v23  ;;  %v680_v33 = vmul.f32 %v2664_v13, %v659_v57  ;;  %v716_v60 = vmul.f32 %v2648_v10, %v2986_v22  ;;  %v765_v16 = vsel %vm757_vm3, %v748_v46, %v749_v28  ;;  %v626_v32 = vadd.f32 %v610_v19, %v540_v50  ;;  %v2341_v23 = vld [vmem:[%s3947_s5 + $0x24] ss:$8 sps:$4 sm:$0xff]   ;;  %v2344_v19 = vld [vmem:[%s3947_s5 + $0x34] ss:$8 sps:$4 sm:$0xff]  }
  0x59   : > { %v803_v63 = vadd.f32 %v787_v34, %v733_v2  ;;  %v786_v24 = vmul.f32 %v2685_v17, %v765_v16  ;;  %v835_v62 = vsel %vm827_vm4, %v818_v56, %v819_v25  ;;  %982 = vadd.xlane.f32.xlu0 %v3150_v35  ;;  %v1025_v52 = vmul.f32 %v3150_v35, %v3150_v35  ;;  %v2340_v25 = vld [vmem:[%s3947_s5 + $0x10] ss:$8 sps:$4 sm:$0xff]  }
  0x5a   : > { %v856_v0 = vmul.f32 %v2687_v18, %v835_v62  ;;  %v905_v46 = vsel %vm897_vm5, %v888_v45, %v889_v61  ;;  %v503_v28 = vrot.slane %v3085_v40, 5  ;;  %v696_v14 = vadd.f32 %v680_v33, %v626_v32  ;;  %1338 = vmatpush1.bf16.msra.mxu0 %v2340_v25 }
  0x5b   : > { %v873_v39 = vadd.f32 %v857_v51, %v803_v63  ;;  %v926_v29 = vmul.f32 %v2747_v44, %v905_v46  ;;  %v504_v56 = vrot.slane %v3160_v55, 5  ;;  %v575_v22 = vrot.slane %v3085_v40, 6  ;;  %v2343_v51 = vld [vmem:[%s3947_s5 + $0x20] ss:$8 sps:$4 sm:$0xff]   ;;  %1339 = vmatprep.subr.bf16.mxu0 %v2341_v23 }
  0x5c   : > { %v576_v45 = vrot.slane %v3160_v55, 6  ;;  %v645_v61 = vrot.slane %v3085_v40, 7  ;;  %v646_v34 = vrot.slane %v3160_v55, 7  ;;  %v732_v30 = vadd.f32 %v716_v60, %v696_v14 }
  0x5d   : > { %v943_v58 = vadd.f32 %v927_v3, %v873_v39  ;;  %v516_v47 = vsel %vm511_vm0, %v503_v28, %v504_v56  ;;  %v719_v15 = vmul.f32 %v2648_v10, %v3160_v55  ;;  %1047 = vadd.xlane.f32.xlu0 %v1025_v52  ;;  %v751_v3 = vrot.slane %v3160_v55, 1 }
  0x5e   : > { %v543_v49 = vmul.f32 %v2644_v9, %v516_v47  ;;  %v586_v50 = vsel %vm581_vm1, %v575_v22, %v576_v45  ;;  %v656_v2 = vsel %vm651_vm2, %v645_v61, %v646_v34  ;;  %v802_v33 = vadd.f32 %v786_v24, %v732_v30  ;;  %1340 = vmatpush1.bf16.msra.mxu0 %v2343_v51  ;;  %v2346_v30 = vld [vmem:[%s3947_s5 + $0x30] ss:$8 sps:$4 sm:$0xff]  }
  0x5f   : > { %v3214_v57 = vadd.f32 %v2691_v20, %v943_v58  ;;  %v613_v60 = vmul.f32 %v2660_v12, %v586_v50  ;;  %v683_v16 = vmul.f32 %v2664_v13, %v656_v2  ;;  %v752_v63 = vrot.slane %v3189_v36, 1  ;;  %1341 = vmatprep.subr.bf16.mxu0 %v2344_v19 }
  0x60   : > { %v821_v32 = vrot.slane %v3160_v55, 2  ;;  %v822_v62 = vrot.slane %v3189_v36, 2  ;;  %v891_v52 = vrot.slane %v3160_v55, 3  ;;  %v872_v46 = vadd.f32 %v856_v0, %v802_v33 }
  0x61   : > { %988 = vadd.xlane.f32.xlu1 %v3214_v57  ;;  %v1028_v39 = vmul.f32 %v3214_v57, %v3214_v57  ;;  %v629_v14 = vadd.f32 %v613_v60, %v543_v49  ;;  %v892_v24 = vrot.slane %v3189_v36, 3  ;;  %v762_v25 = vsel %vm757_vm3, %v751_v3, %v752_v63 }
  0x62   : > { %v832_v23 = vsel %vm827_vm4, %v821_v32, %v822_v62  ;;  %v517_v0 = vsel %vm511_vm0, %v502_v59, %v503_v28  ;;  %v587_v58 = vsel %vm581_vm1, %v574_v38, %v575_v22  ;;  %v942_v47 = vadd.f32 %v926_v29, %v872_v46  ;;  %v2347_v29 = vld [vmem:[%s3947_s5 + $0x44] ss:$8 sps:$4 sm:$0xff]   ;;  %1342 = vmatpush1.bf16.msra.mxu0 %v2346_v30 }
  0x63   : > { %v699_v51 = vadd.f32 %v683_v16, %v629_v14  ;;  %v789_v49 = vmul.f32 %v2685_v17, %v762_v25  ;;  %v859_v50 = vmul.f32 %v2687_v18, %v832_v23  ;;  %v902_v59 = vsel %vm897_vm5, %v891_v52, %v892_v24  ;;  %v3266_v16 = vld [vmem:[%s2657_s25 + $0x68] sm:$0xff]  ;;  %1343 = vmatprep.subr.bf16.mxu0 %v2347_v29 }
  0x64   : > { %v542_v28 = vmul.f32 %v2644_v9, %v517_v0  ;;  %v612_v38 = vmul.f32 %v2660_v12, %v587_v58  ;;  %v657_v22 = vsel %vm651_vm2, %v644_v42, %v645_v61  ;;  %v3261_v2 = vadd.f32 %v2691_v20, %v942_v47  ;;  %v2350_v0 = vld [vmem:[%s3947_s5 + $0x54] ss:$8 sps:$4 sm:$0xff]  }
  0x65   : > { %1053 = vadd.xlane.f32.xlu1 %v1028_v39  ;;  %v735_v19 = vadd.f32 %v719_v15, %v699_v51  ;;  %v929_v33 = vmul.f32 %v2747_v44, %v902_v59  ;;  %v682_v60 = vmul.f32 %v2664_v13, %v657_v22  ;;  %v718_v41 = vmul.f32 %v2648_v10, %v3085_v40  ;;  %v2349_v15 = vld [vmem:[%s3947_s5 + $0x40] ss:$8 sps:$4 sm:$0xff]  }
  0x66   : > { %v628_v46 = vadd.f32 %v612_v38, %v542_v28  ;;  %v763_v42 = vsel %vm757_vm3, %v750_v11, %v751_v3  ;;  %v833_v61 = vsel %vm827_vm4, %v820_v54, %v821_v32  ;;  %986 = vadd.xlane.f32.xlu0 %v3261_v2  ;;  %v1027_v39 = vmul.f32 %v3261_v2, %v3261_v2 }
  0x67   : > { %v805_v14 = vadd.f32 %v789_v49, %v735_v19  ;;  %v788_v25 = vmul.f32 %v2685_v17, %v763_v42  ;;  %v858_v11 = vmul.f32 %v2687_v18, %v833_v61  ;;  %v903_v54 = vsel %vm897_vm5, %v890_v31, %v891_v52  ;;  %v3299_v49 = vld [vmem:[%s2657_s25 + $0x70] sm:$0xff]  ;;  %1344 = vmatpush1.bf16.msra.mxu0 %v2349_v15  ;;  %v2353_v19 = vld [vmem:[%s3947_s5 + $0x64] ss:$8 sps:$4 sm:$0xff]  }
  0x68   : > { %v698_v3 = vadd.f32 %v682_v60, %v628_v46  ;;  %v505_v32 = vrot.slane %v3189_v36, 5  ;;  %v506_v23 = vrot.slane %v3266_v16, 5  ;;  %v928_v30 = vmul.f32 %v2747_v44, %v903_v54  ;;  %1345 = vmatprep.subr.bf16.mxu0 %v2350_v0  ;;  %v2355_v0 = vld [vmem:[%s3947_s5 + $0x60] ss:$8 sps:$4 sm:$0xff]  }
  0x69   : > { %v875_v58 = vadd.f32 %v859_v50, %v805_v14  ;;  %v577_v47 = vrot.slane %v3189_v36, 6  ;;  %v578_v51 = vrot.slane %v3266_v16, 6  ;;  %v647_v52 = vrot.slane %v3189_v36, 7  ;;  %v2352_v50 = vld [vmem:[%s3947_s5 + $0x50] ss:$8 sps:$4 sm:$0xff]  }
  0x6a   : > { %v734_v40 = vadd.f32 %v718_v41, %v698_v3  ;;  %v514_v31 = vsel %vm511_vm0, %v505_v32, %v506_v23  ;;  %v648_v59 = vrot.slane %v3266_v16, 7  ;;  %1051 = vadd.xlane.f32.xlu0 %v1027_v39  ;;  %v721_v29 = vmul.f32 %v2648_v10, %v3266_v16 }
  0x6b   : > { %v945_v28 = vadd.f32 %v929_v33, %v875_v58  ;;  %v545_v38 = vmul.f32 %v2644_v9, %v514_v31  ;;  %v584_v22 = vsel %vm581_vm1, %v577_v47, %v578_v51  ;;  %v753_v41 = vrot.slane %v3266_v16, 1  ;;  %1346 = vmatpush1.bf16.msra.mxu0 %v2352_v50 }
  0x6c   : > { %v804_v60 = vadd.f32 %v788_v25, %v734_v40  ;;  %v615_v46 = vmul.f32 %v2660_v12, %v584_v22  ;;  %v654_v33 = vsel %vm651_vm2, %v647_v52, %v648_v59  ;;  %v754_v15 = vrot.slane %v3299_v49, 1  ;;  %1347 = vmatprep.subr.bf16.mxu0 %v2353_v19  ;;  %v2356_v19 = vld [vmem:[%s3947_s5 + $0x74] ss:$8 sps:$4 sm:$0xff]  }
  0x6d   : > { %v3327_v42 = vadd.f32 %v2691_v20, %v945_v28  ;;  %v685_v61 = vmul.f32 %v2664_v13, %v654_v33  ;;  %v823_v39 = vrot.slane %v3266_v16, 2  ;;  %v824_v3 = vrot.slane %v3299_v49, 2 }
  0x6e   : > { %v874_v14 = vadd.f32 %v858_v11, %v804_v60  ;;  %v631_v25 = vadd.f32 %v615_v46, %v545_v38  ;;  %v893_v54 = vrot.slane %v3266_v16, 3  ;;  %v760_v11 = vsel %vm757_vm3, %v753_v41, %v754_v15 }
  0x6f   : > { %992 = vadd.xlane.f32.xlu1 %v3327_v42  ;;  %v1030_v58 = vmul.f32 %v3327_v42, %v3327_v42  ;;  %v894_v40 = vrot.slane %v3299_v49, 3  ;;  %v515_v31 = vsel %vm511_vm0, %v504_v56, %v505_v32  ;;  %v791_v38 = vmul.f32 %v2685_v17, %v760_v11  ;;  %1348 = vmatpush1.bf16.msra.mxu0 %v2355_v0  ;;  %v481_v11 = vld [vmem:[%s448_s24] sm:$0xff] }
  0x70   : > { %v944_v50 = vadd.f32 %v928_v30, %v874_v14  ;;  %v701_v28 = vadd.f32 %v685_v61, %v631_v25  ;;  %v830_v22 = vsel %vm827_vm4, %v823_v39, %v824_v3  ;;  %v544_v32 = vmul.f32 %v2644_v9, %v515_v31  ;;  %v3401_v31 = vld [vmem:[%s2657_s25 + $0x78] sm:$0xff]  ;;  %1349 = vmatprep.subr.bf16.mxu0 %v2356_v19 }
  0x71   : > { %v861_v60 = vmul.f32 %v2687_v18, %v830_v22  ;;  %v900_v56 = vsel %vm897_vm5, %v893_v54, %v894_v40  ;;  %v585_v30 = vsel %vm581_vm1, %v576_v45, %v577_v47  ;;  %v2358_v45 = vld [vmem:[%s3947_s5 + $0x70] ss:$8 sps:$4 sm:$0xff]   ;;  %v655_v47 = vsel %vm651_vm2, %v646_v34, %v647_v52 }
  0x72   : > { %v3375_v46 = vadd.f32 %v2691_v20, %v944_v50  ;;  %v737_v33 = vadd.f32 %v721_v29, %v701_v28  ;;  %v931_v61 = vmul.f32 %v2747_v44, %v900_v56  ;;  %v614_v14 = vmul.f32 %v2660_v12, %v585_v30 }
  0x73   : > { %1057 = vadd.xlane.f32.xlu1 %v1030_v58  ;;  %v720_v25 = vmul.f32 %v2648_v10, %v3189_v36  ;;  %v761_v29 = vsel %vm757_vm3, %v752_v63, %v753_v41  ;;  %v831_v0 = vsel %vm827_vm4, %v822_v62, %v823_v39  ;;  %v684_v58 = vmul.f32 %v2664_v13, %v655_v47 }
  0x74   : > { %990 = vadd.xlane.f32.xlu0 %v3375_v46  ;;  %v1029_v55 = vmul.f32 %v3375_v46, %v3375_v46  ;;  %v807_v34 = vadd.f32 %v791_v38, %v737_v33  ;;  %v630_v52 = vadd.f32 %v614_v14, %v544_v32  ;;  %v790_v50 = vmul.f32 %v2685_v17, %v761_v29 }
  0x75   : > { %v860_v63 = vmul.f32 %v2687_v18, %v831_v0  ;;  %v901_v62 = vsel %vm897_vm5, %v892_v24, %v893_v54  ;;  %v488_v41 = vstv %s487_s26  ;;  %1350 = vmatpush1.bf16.msra.mxu0 %v2358_v45  ;;  %v507_v56 = vrot.slane %v3299_v49, 5  ;;  %s3864_s26 = scalar_lea.vmem %s3950_s8, %s2641_s22 }
  0x76   : > { %v877_v39 = vadd.f32 %v861_v60, %v807_v34  ;;  %v700_v28 = vadd.f32 %v684_v58, %v630_v52  ;;  %v930_v38 = vmul.f32 %v2747_v44, %v901_v62  ;;  %v489_v22 = vmul.f32 %v488_v41, %v481_v11 }
  0x77   : > { %v508_v32 = vrot.slane %v3401_v31, 5  ;;  %v579_v30 = vrot.slane %v3299_v49, 6  ;;  %v580_v33 = vrot.slane %v3401_v31, 6  ;;  %v649_v24 = vrot.slane %v3299_v49, 7 }
  0x78   : > { %1055 = vadd.xlane.f32.xlu0 %v1029_v55  ;;  %v947_v36 = vadd.f32 %v931_v61, %v877_v39  ;;  %v736_v14 = vadd.f32 %v720_v25, %v700_v28  ;;  %v650_v54 = vrot.slane %v3401_v31, 7  ;;  %v723_v45 = vmul.f32 %v2648_v10, %v3401_v31 }
  0x79   : > { %v512_v60 = vsel %vm511_vm0, %v507_v56, %v508_v32  ;;  %v582_v19 = vsel %vm581_vm1, %v579_v30, %v580_v33  ;;  %v755_v47 = vrot.slane %v3401_v31, 1  ;;  %v756_v55 = vrot.slane %v489_v22, 1 }
  0x7a   : > { %v3424_v29 = vadd.f32 %v2691_v20, %v947_v36  ;;  %v806_v61 = vadd.f32 %v790_v50, %v736_v14  ;;  %v547_v25 = vmul.f32 %v2644_v9, %v512_v60  ;;  %v617_v0 = vmul.f32 %v2660_v12, %v582_v19 }
  0x7b   : > { %v652_v11 = vsel %vm651_vm2, %v649_v24, %v650_v54  ;;  %v825_v34 = vrot.slane %v3401_v31, 2  ;;  %v826_v52 = vrot.slane %v489_v22, 2  ;;  %v758_v39 = vsel %vm757_vm3, %v755_v47, %v756_v55 }
  0x7c   : > { %996 = vadd.xlane.f32.xlu1 %v3424_v29  ;;  %v876_v58 = vadd.f32 %v860_v63, %v806_v61  ;;  %v1032_v62 = vmul.f32 %v3424_v29, %v3424_v29  ;;  %v633_v41 = vadd.f32 %v617_v0, %v547_v25  ;;  %v687_v50 = vmul.f32 %v2664_v13, %v652_v11 }
  0x7d   : > { %v828_v28 = vsel %vm827_vm4, %v825_v34, %v826_v52  ;;  %v895_v32 = vrot.slane %v3401_v31, 3  ;;  %v896_v33 = vrot.slane %v489_v22, 3  ;;  %v793_v54 = vmul.f32 %v2685_v17, %v758_v39 }
  0x7e   : > { %v946_v36 = vadd.f32 %v930_v38, %v876_v58  ;;  %v703_v14 = vadd.f32 %v687_v50, %v633_v41  ;;  %v513_v60 = vsel %vm511_vm0, %v506_v23, %v507_v56  ;;  %v583_v19 = vsel %vm581_vm1, %v578_v51, %v579_v30 }
  0x7f   : > { %v898_v63 = vsel %vm897_vm5, %v895_v32, %v896_v33  ;;  %v653_v31 = vsel %vm651_vm2, %v648_v59, %v649_v24  ;;  %v863_v61 = vmul.f32 %v2687_v18, %v828_v28  ;;  %v546_v25 = vmul.f32 %v2644_v9, %v513_v60 }
  0x80   : > { %v3456_v38 = vadd.f32 %v2691_v20, %v946_v36  ;;  %1061 = vadd.xlane.f32.xlu1 %v1032_v62  ;;  %v739_v22 = vadd.f32 %v723_v45, %v703_v14  ;;  %v616_v23 = vmul.f32 %v2660_v12, %v583_v19  ;;  %v686_v56 = vmul.f32 %v2664_v13, %v653_v31 }
  0x81   : > { %v933_v59 = vmul.f32 %v2747_v44, %v898_v63  ;;  %v759_v30 = vsel %vm757_vm3, %v754_v15, %v755_v47  ;;  %v722_v9 = vmul.f32 %v2648_v10, %v3299_v49  ;;  %v829_v13 = vsel %vm827_vm4, %v824_v3, %v825_v34 }
  0x82   : > { %994 = vadd.xlane.f32.xlu0 %v3456_v38  ;;  %v1031_v16 = vmul.f32 %v3456_v38, %v3456_v38  ;;  %v809_v51 = vadd.f32 %v793_v54, %v739_v22  ;;  %v632_v24 = vadd.f32 %v616_v23, %v546_v25  ;;  %v792_v0 = vmul.f32 %v2685_v17, %v759_v30 }
  0x83   : > { %v2529_v11 = vmov 0   ;;  %v899_v15 = vsel %vm897_vm5, %v894_v40, %v895_v32  ;;  %v862_v47 = vmul.f32 %v2687_v18, %v829_v13 }
  0x84   : > { %v879_v12 = vadd.f32 %v863_v61, %v809_v51  ;;  %v702_v45 = vadd.f32 %v686_v56, %v632_v24  ;;  %1367 = vmatprep.mubr.bf16.mxu0 %v2529_v11  ;;  %v932_v34 = vmul.f32 %v2747_v44, %v899_v15  ;;  %v2471_v15 = vld [vmem:[%s3946_s4] sm:$0xff] }
  0x86   : > { %1059 = vadd.xlane.f32.xlu0 %v1031_v16  ;;  %v949_v55 = vadd.f32 %v933_v59, %v879_v12  ;;  %v738_v10 = vadd.f32 %v722_v9, %v702_v45 }
  0x88   : > { %v3484_v52 = vadd.f32 %v2691_v20, %v949_v55  ;;  %v808_v3 = vadd.f32 %v792_v0, %v738_v10  ;;  %v3501_v10 = vrot.slane %v2471_v15, %v2629_v5 }
  0x8a   : > { %1000 = vadd.xlane.f32.xlu1 %v3484_v52  ;;  %v1034_v17 = vmul.f32 %v3484_v52, %v3484_v52  ;;  %v878_v58 = vadd.f32 %v862_v47, %v808_v3 }
  0x8c   : > { %v948_v62 = vadd.f32 %v932_v34, %v878_v58 }
  0x8e   : > { %1065 = vadd.xlane.f32.xlu1 %v1034_v17  ;;  %v3491_v49 = vadd.f32 %v2691_v20, %v948_v62 }
  0x90   : > { %998 = vadd.xlane.f32.xlu0 %v3491_v49  ;;  %v1033_v18 = vmul.f32 %v3491_v49, %v3491_v49 }
  0x94   : > { %1063 = vadd.xlane.f32.xlu0 %v1033_v18 }
  0xba   : > { %v1038_v40 = vpop.xlane.xlu1 %1037 }
  0xbb   : > { %v1068_v54 = vmul.f32 0.0078125, %v1038_v40  ;;  %v3507_v40 = vrot.slane %v2471_v15, %v670_v6 }
  0xc1   : > { %v971_v41 = vpop.xlane.xlu0 %970 }
  0xc2   : > { %v1003_v44 = vmul.f32 0.0078125, %v971_v41 }
  0xc3   : > { %v1036_v50 = vpop.xlane.xlu1 %1035 }
  0xc4   : > { %v1083_v39 = vmul.f32 %v1003_v44, %v1003_v44  ;;  %v1067_v28 = vmul.f32 0.0078125, %v1036_v50  ;;  %v1115_v12 = vsub.f32 %v2879_v21, %v1003_v44 }
  0xc5   : > { %v973_v32 = vpop.xlane.xlu0 %972 }
  0xc6   : > { %v1099_v33 = vsub.f32 %v1067_v28, %v1083_v39  ;;  %v1004_v36 = vmul.f32 0.0078125, %v973_v32 }
  0xc7   : > { %v977_v14 = vpop.xlane.xlu1 %976 }
  0xc8   : > { %v1131_v63 = vadd.f32 1e-05, %v1099_v33  ;;  %v1084_v20 = vmul.f32 %v1004_v36, %v1004_v36  ;;  %v1006_v60 = vmul.f32 0.0078125, %v977_v14  ;;  %v1116_v34 = vsub.f32 %v2815_v53, %v1004_v36 }
  0xca   : > { %2375 = vrsqrt.f32 %v1131_v63  ;;  %v1100_v19 = vsub.f32 %v1068_v54, %v1084_v20  ;;  %v1086_v31 = vmul.f32 %v1006_v60, %v1006_v60  ;;  %v1118_v39 = vsub.f32 %v2911_v27, %v1006_v60 }
  0xcb   : > { %v975_v22 = vpop.xlane.xlu0 %974  ;;  %v1042_v61 = vpop.xlane.xlu1 %1041 }
  0xcc   : > { %v1132_v25 = vadd.f32 1e-05, %v1100_v19  ;;  %v1005_v23 = vmul.f32 0.0078125, %v975_v22  ;;  %v1070_v56 = vmul.f32 0.0078125, %v1042_v61 }
  0xce   : > { %2377 = vrsqrt.f32 %v1132_v25  ;;  %v1085_v16 = vmul.f32 %v1005_v23, %v1005_v23  ;;  %v1102_v51 = vsub.f32 %v1070_v56, %v1086_v31  ;;  %v1117_v20 = vsub.f32 %v2950_v48, %v1005_v23 }
  0xcf   : > { %v1040_v59 = vpop.xlane.xlu0 %1039 }
  0xd0   : > { %v1134_v30 = vadd.f32 1e-05, %v1102_v51  ;;  %v1069_v24 = vmul.f32 0.0078125, %v1040_v59 }
  0xd2   : > { %2379 = vrsqrt.f32 %v1134_v30  ;;  %v1101_v9 = vsub.f32 %v1069_v24, %v1085_v16 }
  0xd3   : > { %v981_v13 = vpop.xlane.xlu1 %980 }
  0xd4   : > { %v2376_v45 = vpop.eup %2375  ;;  %v1133_v0 = vadd.f32 1e-05, %v1101_v9  ;;  %v1008_v55 = vmul.f32 0.0078125, %v981_v13 }
  0xd5   : > { %v1163_v47 = vmul.f32 %v2376_v45, %v1115_v12 }
  0xd6   : > { %2381 = vrsqrt.f32 %v1133_v0  ;;  %v1088_v3 = vmul.f32 %v1008_v55, %v1008_v55  ;;  %v1120_v0 = vsub.f32 %v3008_v43, %v1008_v55 }
  0xd7   : > { %v1046_v17 = vpop.xlane.xlu1 %1045  ;;  %v1183_v18 = vmul.f32 %v3501_v10, %v1163_v47 }
  0xd8   : > { %v2378_v58 = vpop.eup %2377  ;;  %v1072_v62 = vmul.f32 0.0078125, %v1046_v17 }
  0xd9   : > { %v1164_v21 = vmul.f32 %v2378_v58, %v1116_v34  ;;  %v1203_v36 = vadd.f32 %v3507_v40, %v1183_v18 }
  0xda   : > { %v979_v41 = vpop.xlane.xlu0 %978  ;;  %v1104_v44 = vsub.f32 %v1072_v62, %v1088_v3 }
  0xdb   : > { %v1184_v50 = vmul.f32 %v3501_v10, %v1164_v21  ;;  %v1007_v28 = vmul.f32 0.0078125, %v979_v41 }
  0xdc   : > { %v2380_v32 = vpop.eup %2379  ;;  %v1136_v33 = vadd.f32 1e-05, %v1104_v44 }
  0xdd   : > { %v1087_v53 = vmul.f32 %v1007_v28, %v1007_v28  ;;  %v1204_v14 = vadd.f32 %v3507_v40, %v1184_v50  ;;  %v1166_v54 = vmul.f32 %v2380_v32, %v1118_v39  ;;  %v1119_v58 = vsub.f32 %v3062_v26, %v1007_v28 }
  0xde   : > { %v1044_v63 = vpop.xlane.xlu0 %1043  ;;  %2383 = vrsqrt.f32 %v1136_v33 }
  0xdf   : > { %v1071_v6 = vmul.f32 0.0078125, %v1044_v63  ;;  %v1219_v19 = vpack.c.bf16 %v1204_v14, %v1203_v36  ;;  %v1186_v60 = vmul.f32 %v3501_v10, %v1166_v54 }
  0xe0   : > { %v2382_v31 = vpop.eup %2381 }
  0xe1   : > { %v1103_v22 = vsub.f32 %v1071_v6, %v1087_v53  ;;  %v985_v61 = vpop.xlane.xlu1 %984  ;;  %1368 = vmatmul.mubr.bf16.vlgmr.msra.gmra.mrb[0].mxu0 %v1219_v19  ;;  %v1165_v27 = vmul.f32 %v2382_v31, %v1117_v20  ;;  %v1206_v23 = vadd.f32 %v3507_v40, %v1186_v60 }
  0xe2   : > { %v1010_v25 = vmul.f32 0.0078125, %v985_v61  ;;  %1377 = vmatprep.mubr.bf16.mxu0 %v2529_v11 }
  0xe3   : > { %v1135_v56 = vadd.f32 1e-05, %v1103_v22  ;;  %v1185_v16 = vmul.f32 %v3501_v10, %v1165_v27 }
  0xe4   : > { %v1090_v51 = vmul.f32 %v1010_v25, %v1010_v25  ;;  %v1122_v20 = vsub.f32 %v3110_v37, %v1010_v25 }
  0xe5   : > { %2385 = vrsqrt.f32 %v1135_v56  ;;  %v1050_v59 = vpop.xlane.xlu1 %1049  ;;  %v1205_v48 = vadd.f32 %v3507_v40, %v1185_v16 }
  0xe6   : > { %v1074_v30 = vmul.f32 0.0078125, %v1050_v59  ;;  %v983_v24 = vpop.xlane.xlu0 %982 }
  0xe7   : > { %v1220_v9 = vpack.c.bf16 %v1206_v23, %v1205_v48  ;;  %v1009_v12 = vmul.f32 0.0078125, %v983_v24 }
  0xe8   : > { %v1106_v13 = vsub.f32 %v1074_v30, %v1090_v51  ;;  %v2384_v45 = vpop.eup %2383 }
  0xe9   : > { %1378 = vmatmul.mubr.bf16.gmra.mrb[4].mxu0 %v1220_v9  ;;  %v1089_v15 = vmul.f32 %v1009_v12, %v1009_v12  ;;  %v1168_v17 = vmul.f32 %v2384_v45, %v1120_v0  ;;  %v1121_v27 = vsub.f32 %v3150_v35, %v1009_v12 }
  0xea   : > { %v1138_v47 = vadd.f32 1e-05, %v1106_v13  ;;  %1387 = vmatprep.mubr.bf16.mxu0 %v2529_v11  ;;  %v1048_v3 = vpop.xlane.xlu0 %1047 }
  0xeb   : > { %v1073_v34 = vmul.f32 0.0078125, %v1048_v3  ;;  %v1188_v39 = vmul.f32 %v3501_v10, %v1168_v17 }
  0xec   : > { %2387 = vrsqrt.f32 %v1138_v47 }
  0xed   : > { %v1105_v62 = vsub.f32 %v1073_v34, %v1089_v15  ;;  %v1208_v14 = vadd.f32 %v3507_v40, %v1188_v39 }
  0xee   : > { %v989_v21 = vpop.xlane.xlu1 %988 }
  0xef   : > { %v2386_v18 = vpop.eup %2385  ;;  %v1012_v41 = vmul.f32 0.0078125, %v989_v21  ;;  %v1137_v44 = vadd.f32 1e-05, %v1105_v62 }
  0xf0   : > { %v1167_v50 = vmul.f32 %v2386_v18, %v1119_v58 }
  0xf1   : > { %v1092_v32 = vmul.f32 %v1012_v41, %v1012_v41  ;;  %2389 = vrsqrt.f32 %v1137_v44  ;;  %v1124_v47 = vsub.f32 %v3214_v57, %v1012_v41 }
  0xf2   : > { %v1054_v43 = vpop.xlane.xlu1 %1053  ;;  %v1187_v55 = vmul.f32 %v3501_v10, %v1167_v50 }
  0xf3   : > { %v1076_v33 = vmul.f32 0.0078125, %v1054_v43  ;;  %v987_v53 = vpop.xlane.xlu0 %986 }
  0xf4   : > { %v1207_v36 = vadd.f32 %v3507_v40, %v1187_v55  ;;  %v1011_v26 = vmul.f32 0.0078125, %v987_v53 }
  0xf5   : > { %v1108_v28 = vsub.f32 %v1076_v33, %v1092_v32 }
  0xf6   : > { %v2388_v54 = vpop.eup %2387  ;;  %v1221_v63 = vpack.c.bf16 %v1208_v14, %v1207_v36  ;;  %v1091_v6 = vmul.f32 %v1011_v26, %v1011_v26  ;;  %v1123_v21 = vsub.f32 %v3261_v2, %v1011_v26 }
  0xf7   : > { %v1140_v19 = vadd.f32 1e-05, %v1108_v28  ;;  %v1052_v31 = vpop.xlane.xlu0 %1051  ;;  %v1170_v61 = vmul.f32 %v2388_v54, %v1122_v20 }
  0xf8   : > { %1388 = vmatmul.mubr.bf16.gmra.mrb[8].mxu0 %v1221_v63  ;;  %v1075_v22 = vmul.f32 0.0078125, %v1052_v31 }
  0xf9   : > { %2391 = vrsqrt.f32 %v1140_v19  ;;  %1397 = vmatprep.mubr.bf16.mxu0 %v2529_v11  ;;  %v1190_v23 = vmul.f32 %v3501_v10, %v1170_v61 }
  0xfa   : > { %v1107_v60 = vsub.f32 %v1075_v22, %v1091_v6 }
  0xfb   : > { %v2390_v56 = vpop.eup %2389  ;;  %v1210_v45 = vadd.f32 %v3507_v40, %v1190_v23 }
  0xfc   : > { %v993_v16 = vpop.xlane.xlu1 %992  ;;  %v1139_v51 = vadd.f32 1e-05, %v1107_v60  ;;  %v1169_v48 = vmul.f32 %v2390_v56, %v1121_v27 }
  0xfd   : > { %v1014_v59 = vmul.f32 0.0078125, %v993_v16 }
  0xfe   : > { %2393 = vrsqrt.f32 %v1139_v51  ;;  %v1189_v25 = vmul.f32 %v3501_v10, %v1169_v48 }
  0xff   : > { %v1094_v37 = vmul.f32 %v1014_v59, %v1014_v59  ;;  %v1126_v20 = vsub.f32 %v3327_v42, %v1014_v59 }
 0x100   : > { %v1058_v30 = vpop.xlane.xlu1 %1057  ;;  %v1209_v13 = vadd.f32 %v3507_v40, %v1189_v25 }
 0x101   : > { %v991_v24 = vpop.xlane.xlu0 %990  ;;  %v1078_v9 = vmul.f32 0.0078125, %v1058_v30 }
 0x102   : > { %v1013_v35 = vmul.f32 0.0078125, %v991_v24  ;;  %v1222_v15 = vpack.c.bf16 %v1210_v45, %v1209_v13 }
 0x103   : > { %v2392_v12 = vpop.eup %2391  ;;  %v1110_v0 = vsub.f32 %v1078_v9, %v1094_v37 }
 0x104   : > { %v1093_v3 = vmul.f32 %v1013_v35, %v1013_v35  ;;  %1398 = vmatmul.mubr.bf16.gmra.mrb[12].mxu0 %v1222_v15  ;;  %v1172_v62 = vmul.f32 %v2392_v12, %v1124_v47  ;;  %v1125_v27 = vsub.f32 %v3375_v46, %v1013_v35 }
 0x105   : > { %v1142_v34 = vadd.f32 1e-05, %v1110_v0  ;;  %v1056_v17 = vpop.xlane.xlu0 %1055  ;;  %1407 = vmatprep.mubr.bf16.mxu0 %v2529_v11 }
 0x106   : > { %v1077_v58 = vmul.f32 0.0078125, %v1056_v17  ;;  %v1192_v55 = vmul.f32 %v3501_v10, %v1172_v62 }
 0x107   : > { %2395 = vrsqrt.f32 %v1142_v34 }
 0x108   : > { %v1109_v18 = vsub.f32 %v1077_v58, %v1093_v3  ;;  %v2394_v44 = vpop.eup %2393  ;;  %v1212_v14 = vadd.f32 %v3507_v40, %v1192_v55 }
 0x109   : > { %v997_v50 = vpop.xlane.xlu1 %996  ;;  %v1171_v43 = vmul.f32 %v2394_v44, %v1123_v21 }
 0x10a   : > { %v1141_v39 = vadd.f32 1e-05, %v1109_v18  ;;  %v1016_v32 = vmul.f32 0.0078125, %v997_v50 }
 0x10b   : > { %v1191_v41 = vmul.f32 %v3501_v10, %v1171_v43 }
 0x10c   : > { %2397 = vrsqrt.f32 %v1141_v39  ;;  %v1096_v57 = vmul.f32 %v1016_v32, %v1016_v32  ;;  %v1128_v12 = vsub.f32 %v3424_v29, %v1016_v32 }
 0x10d   : > { %v1062_v33 = vpop.xlane.xlu1 %1061  ;;  %v1211_v36 = vadd.f32 %v3507_v40, %v1191_v41 }
 0x10e   : > { %v1080_v53 = vmul.f32 0.0078125, %v1062_v33 }
 0x10f   : > { %v995_v28 = vpop.xlane.xlu0 %994  ;;  %v1223_v54 = vpack.c.bf16 %v1212_v14, %v1211_v36 }
 0x110   : > { %v1015_v2 = vmul.f32 0.0078125, %v995_v28  ;;  %v1112_v26 = vsub.f32 %v1080_v53, %v1096_v57 }
 0x111   : > { %v2396_v63 = vpop.eup %2395  ;;  %1408 = vmatmul.mubr.bf16.gmra.mrb[16].mxu0 %v1223_v54  ;;  %v2364_v54 = vld [vmem:[%s3949_s7 + $0x10] sm:$0xff]  }
 0x112   : > { %v1095_v6 = vmul.f32 %v1015_v2, %v1015_v2  ;;  %v1144_v19 = vadd.f32 1e-05, %v1112_v26  ;;  %1417 = vmatprep.mubr.bf16.mxu0 %v2529_v11  ;;  %v1174_v22 = vmul.f32 %v2396_v63, %v1126_v20  ;;  %v1127_v17 = vsub.f32 %v3456_v38, %v1015_v2  ;;  %v2365_v63 = vld [vmem:[%s3949_s7 + $0x58] sm:$0xff]  }
 0x113   : > { %v1060_v31 = vpop.xlane.xlu0 %1059  ;;  %v2366_v20 = vld [vmem:[%s3949_s7 + $0x18] sm:$0xff]  }
 0x114   : > { %2399 = vrsqrt.f32 %v1144_v19  ;;  %v1079_v61 = vmul.f32 0.0078125, %v1060_v31  ;;  %v1194_v48 = vmul.f32 %v3501_v10, %v1174_v22  ;;  %v2368_v19 = vld [vmem:[%s3949_s7 + $0x20] sm:$0xff]   ;;  %v2369_v31 = vld [vmem:[%s3949_s7 + $0x68] sm:$0xff]  }
 0x115   : > { %v2370_v22 = vld [vmem:[%s3949_s7 + $0x28] sm:$0xff]  }
 0x116   : > { %v2398_v60 = vpop.eup %2397  ;;  %v1111_v56 = vsub.f32 %v1079_v61, %v1095_v6  ;;  %v1214_v24 = vadd.f32 %v3507_v40, %v1194_v48  ;;  %v2367_v6 = vld [vmem:[%s3949_s7 + $0x60] sm:$0xff]   ;;  %v2371_v61 = vld [vmem:[%s3949_s7 + $0x70] sm:$0xff]  }
 0x117   : > { %v1001_v16 = vpop.xlane.xlu1 %1000  ;;  %v1173_v51 = vmul.f32 %v2398_v60, %v1125_v27  ;;  %v2372_v27 = vld [vmem:[%s3949_s7 + $0x30] sm:$0xff]   ;;  %v2373_v60 = vld [vmem:[%s3949_s7 + $0x78] sm:$0xff]  }
 0x118   : > { %v1143_v23 = vadd.f32 1e-05, %v1111_v56  ;;  %v1018_v37 = vmul.f32 0.0078125, %v1001_v16  ;;  %v2374_v56 = vld [vmem:[%s3949_s7 + $0x38] sm:$0xff]   ;;  %v1243_v16 = vld [vmem:[%s3948_s6] sm:$0x3] }
 0x119   : > { %v1193_v42 = vmul.f32 %v3501_v10, %v1173_v51  ;;  %v3613_v51 = vrot.slane %v1243_v16, %v2626_v4  ;;  %v3616_v48 = vrot.slane %v1243_v16, %v2629_v5 }
 0x11a   : > { %2401 = vrsqrt.f32 %v1143_v23  ;;  %v1098_v59 = vmul.f32 %v1018_v37, %v1018_v37  ;;  %v1130_v38 = vsub.f32 %v3484_v52, %v1018_v37  ;;  %v2359_v52 = vld [vmem:[%s3949_s7 + $0x40] sm:$0xff]  }
 0x11b   : > { %v1066_v25 = vpop.xlane.xlu1 %1065  ;;  %v1213_v30 = vadd.f32 %v3507_v40, %v1193_v42  ;;  %2229 = vmatprep.subr.bf16.mxu1 %v2359_v52 }
 0x11c   : > { %v1082_v9 = vmul.f32 0.0078125, %v1066_v25 }
 0x11d   : > { %v1224_v13 = vpack.c.bf16 %v1214_v24, %v1213_v30  ;;  %v999_v45 = vpop.xlane.xlu0 %998 }
 0x11e   : > { %v2400_v46 = vpop.eup %2399  ;;  %v1114_v35 = vsub.f32 %v1082_v9, %v1098_v59  ;;  %v1017_v0 = vmul.f32 0.0078125, %v999_v45 }
 0x11f   : > { %1418 = vmatmul.mubr.bf16.gmra.mrb[20].mxu0 %v1224_v13  ;;  %v1176_v3 = vmul.f32 %v2400_v46, %v1128_v12 }
 0x120   : > { %v1146_v15 = vadd.f32 1e-05, %v1114_v35  ;;  %1427 = vmatprep.mubr.bf16.mxu0 %v2529_v11  ;;  %v1097_v47 = vmul.f32 %v1017_v0, %v1017_v0  ;;  %v1129_v41 = vsub.f32 %v3491_v49, %v1017_v0  ;;  %v2361_v49 = vld [vmem:[%s3949_s7 + $0x48] sm:$0xff]  }
 0x121   : > { %v1064_v34 = vpop.xlane.xlu0 %1063  ;;  %v1196_v44 = vmul.f32 %v3501_v10, %v1176_v3 }
 0x122   : > { %2403 = vrsqrt.f32 %v1146_v15  ;;  %v1081_v58 = vmul.f32 0.0078125, %v1064_v34 }
 0x123   : > { %v1216_v32 = vadd.f32 %v3507_v40, %v1196_v44 }
 0x124   : > { %v2402_v62 = vpop.eup %2401  ;;  %v1113_v21 = vsub.f32 %v1081_v58, %v1097_v47 }
 0x125   : > { %v1175_v18 = vmul.f32 %v2402_v62, %v1127_v17 }
 0x126   : > { %v1145_v50 = vadd.f32 1e-05, %v1113_v21 }
 0x127   : > { %v1195_v29 = vmul.f32 %v3501_v10, %v1175_v18 }
 0x128   : > { %2405 = vrsqrt.f32 %v1145_v50 }
 0x129   : > { %v1215_v39 = vadd.f32 %v3507_v40, %v1195_v29 }
 0x12b   : > { %v1225_v43 = vpack.c.bf16 %v1216_v32, %v1215_v39 }
 0x12c   : > { %v2404_v55 = vpop.eup %2403 }
 0x12d   : > { %1428 = vmatmul.mubr.bf16.gmra.mrb[24].mxu0 %v1225_v43  ;;  %v1178_v57 = vmul.f32 %v2404_v55, %v1130_v38 }
 0x12e   : > { %1437 = vmatprep.mubr.bf16.mxu0 %v2529_v11  ;;  %v2360_v11 = vld [vmem:[%s3949_s7] sm:$0xff]  }
 0x12f   : > { %v1198_v36 = vmul.f32 %v3501_v10, %v1178_v57  ;;  %2230 = vmatpush3.bf16.msra.mxu1 %v2360_v11 }
 0x130   : > { %2231 = vmatprep.subr.bf16.mxu1 %v2361_v49 }
 0x131   : > { %v1218_v2 = vadd.f32 %v3507_v40, %v1198_v36 }
 0x132   : > { %v2406_v33 = vpop.eup %2405 }
 0x133   : > { %v1177_v53 = vmul.f32 %v2406_v33, %v1129_v41 }
 0x135   : > { %v1197_v14 = vmul.f32 %v3501_v10, %v1177_v53  ;;  %v2362_v10 = vld [vmem:[%s3949_s7 + $0x8] sm:$0xff]  }
 0x136   : > { %2232 = vmatpush3.bf16.msra.mxu1 %v2362_v10 }
 0x137   : > { %v1217_v28 = vadd.f32 %v3507_v40, %v1197_v14  ;;  %v2363_v40 = vld [vmem:[%s3949_s7 + $0x50] sm:$0xff]  }
 0x138   : > { %2233 = vmatprep.subr.bf16.mxu1 %v2363_v40 }
 0x139   : > { %v1226_v26 = vpack.c.bf16 %v1218_v2, %v1217_v28 }
 0x13a   : > { %2234 = vmatpush3.bf16.msra.mxu1 %v2364_v54 }
 0x13b   : > { %1438 = vmatmul.mubr.bf16.gmra.mrb[28].mxu0 %v1226_v26  ;;  %2235 = vmatprep.subr.bf16.mxu1 %v2365_v63 }
 0x13e   : > { %2236 = vmatpush3.bf16.msra.mxu1 %v2366_v20 }
 0x13f   : > { %2237 = vmatprep.subr.bf16.mxu1 %v2367_v6 }
 0x142   : > { %2238 = vmatpush3.bf16.msra.mxu1 %v2368_v19 }
 0x143   : > { %2239 = vmatprep.subr.bf16.mxu1 %v2369_v31 }
 0x146   : > { %2240 = vmatpush3.bf16.msra.mxu1 %v2370_v22 }
 0x147   : > { %2241 = vmatprep.subr.bf16.mxu1 %v2371_v61 }
 0x14a   : > { %2242 = vmatpush3.bf16.msra.mxu1 %v2372_v27 }
 0x14b   : > { %2243 = vmatprep.subr.bf16.mxu1 %v2373_v60 }
 0x14e   : > { %2244 = vmatpush3.bf16.msra.mxu1 %v2374_v56 }
 0x1b4   : > { %v1369_v23 = vpop.f32.mrb[0].mxu0 }
 0x1b5   : > { %v3619_v37 = vadd.f32 %v1369_v23, %v3613_v51  ;;  %v1371_v42 = vpop.f32.mrb[1].mxu0 }
 0x1b6   : > { %v3622_v59 = vadd.f32 %v1371_v42, %v3616_v48  ;;  %v1373_v25 = vpop.f32.mrb[2].mxu0 }
 0x1b7   : > { %v1480_v30 = vmul.f32 %v3619_v37, %v3619_v37  ;;  %v3627_v24 = vadd.f32 %v1373_v25, %v3613_v51  ;;  %v1375_v4 = vpop.f32.mrb[3].mxu0 }
 0x1b8   : > { %v1481_v5 = vmul.f32 %v3622_v59, %v3622_v59  ;;  %v3632_v9 = vadd.f32 %v1375_v4, %v3616_v48 }
 0x1b9   : > { %v1512_v13 = vmul.f32 %v1480_v30, %v3619_v37  ;;  %v1482_v46 = vmul.f32 %v3627_v24, %v3627_v24 }
 0x1ba   : > { %v1513_v45 = vmul.f32 %v1481_v5, %v3622_v59  ;;  %v1483_v35 = vmul.f32 %v3632_v9, %v3632_v9 }
 0x1bb   : > { %v1544_v12 = vmul.f32 0.044715, %v1512_v13  ;;  %v1514_v0 = vmul.f32 %v1482_v46, %v3627_v24  ;;  %v1449_v13 = vmul.f32 0.5, %v3622_v59 }
 0x1bc   : > { %v1545_v15 = vmul.f32 0.044715, %v1513_v45  ;;  %v1515_v47 = vmul.f32 %v1483_v35, %v3632_v9  ;;  %v1379_v3 = vpop.f32.mrb[4].mxu0  ;;  %v1448_v45 = vmul.f32 0.5, %v3619_v37 }
 0x1bd   : > { %v1576_v34 = vadd.f32 %v1544_v12, %v3619_v37  ;;  %v1546_v17 = vmul.f32 0.044715, %v1514_v0  ;;  %v3644_v58 = vadd.f32 %v1379_v3, %v3613_v51  ;;  %v1381_v62 = vpop.f32.mrb[5].mxu0 }
 0x1be   : > { %v1547_v21 = vmul.f32 0.044715, %v1515_v47  ;;  %v3647_v18 = vadd.f32 %v1381_v62, %v3616_v48  ;;  %v1383_v44 = vpop.f32.mrb[6].mxu0  ;;  %v1577_v50 = vadd.f32 %v1545_v15, %v3622_v59  ;;  %v1450_v47 = vmul.f32 0.5, %v3627_v24 }
 0x1bf   : > { %v1608_v29 = vmul.f32 0.7978846, %v1576_v34  ;;  %v1578_v39 = vadd.f32 %v1546_v17, %v3627_v24  ;;  %v1484_v32 = vmul.f32 %v3644_v58, %v3644_v58  ;;  %v3654_v43 = vadd.f32 %v1383_v44, %v3613_v51  ;;  %v1385_v55 = vpop.f32.mrb[7].mxu0 }
 0x1c0   : > { %v1485_v38 = vmul.f32 %v3647_v18, %v3647_v18  ;;  %v3659_v57 = vadd.f32 %v1385_v55, %v3616_v48  ;;  %v1579_v41 = vadd.f32 %v1547_v21, %v3632_v9  ;;  %v1609_v33 = vmul.f32 0.7978846, %v1577_v50 }
 0x1c1   : > { %2407 = vtanh.f32 %v1608_v29  ;;  %v1610_v53 = vmul.f32 0.7978846, %v1578_v39  ;;  %v1516_v36 = vmul.f32 %v1484_v32, %v3644_v58  ;;  %v1486_v14 = vmul.f32 %v3654_v43, %v3654_v43 }
 0x1c2   : > { %v1517_v28 = vmul.f32 %v1485_v38, %v3647_v18  ;;  %v1487_v2 = vmul.f32 %v3659_v57, %v3659_v57  ;;  %v1611_v26 = vmul.f32 0.7978846, %v1579_v41  ;;  %2409 = vtanh.f32 %v1609_v33 }
 0x1c3   : > { %2411 = vtanh.f32 %v1610_v53  ;;  %v1548_v52 = vmul.f32 0.044715, %v1516_v36  ;;  %v1518_v11 = vmul.f32 %v1486_v14, %v3654_v43  ;;  %v1451_v59 = vmul.f32 0.5, %v3632_v9 }
 0x1c4   : > { %v1549_v49 = vmul.f32 0.044715, %v1517_v28  ;;  %v1519_v10 = vmul.f32 %v1487_v2, %v3659_v57  ;;  %2413 = vtanh.f32 %v1611_v26  ;;  %v1453_v14 = vmul.f32 0.5, %v3647_v18 }
 0x1c5   : > { %v1580_v40 = vadd.f32 %v1548_v52, %v3644_v58  ;;  %v1550_v54 = vmul.f32 0.044715, %v1518_v11  ;;  %v1455_v52 = vmul.f32 0.5, %v3659_v57 }
 0x1c6   : > { %v1581_v63 = vadd.f32 %v1549_v49, %v3647_v18  ;;  %v1551_v20 = vmul.f32 0.044715, %v1519_v10  ;;  %v1454_v18 = vmul.f32 0.5, %v3654_v43 }
 0x1c7   : > { %v1612_v6 = vmul.f32 0.7978846, %v1580_v40  ;;  %v1582_v19 = vadd.f32 %v1550_v54, %v3654_v43 }
 0x1c8   : > { %v1613_v31 = vmul.f32 0.7978846, %v1581_v63  ;;  %v1583_v22 = vadd.f32 %v1551_v20, %v3659_v57  ;;  %v1452_v63 = vmul.f32 0.5, %v3644_v58 }
 0x1c9   : > { %2415 = vtanh.f32 %v1612_v6  ;;  %v1614_v61 = vmul.f32 0.7978846, %v1582_v19 }
 0x1ca   : > { %2417 = vtanh.f32 %v1613_v31  ;;  %v1615_v27 = vmul.f32 0.7978846, %v1583_v22 }
 0x1cb   : > { %v2408_v60 = vpop.eup %2407  ;;  %2419 = vtanh.f32 %v1614_v61  ;;  %v1389_v56 = vpop.f32.mrb[8].mxu0 }
 0x1cc   : > { %v2410_v16 = vpop.eup %2409  ;;  %2421 = vtanh.f32 %v1615_v27  ;;  %v3675_v23 = vadd.f32 %v1389_v56, %v3613_v51  ;;  %v1391_v42 = vpop.f32.mrb[9].mxu0  ;;  %v1672_v25 = vadd.f32 1.0, %v2408_v60 }
 0x1cd   : > { %v2412_v30 = vpop.eup %2411  ;;  %v3678_v4 = vadd.f32 %v1391_v42, %v3616_v48  ;;  %v1393_v5 = vpop.f32.mrb[10].mxu0  ;;  %v1673_v46 = vadd.f32 1.0, %v2410_v16 }
 0x1ce   : > { %v2414_v35 = vpop.eup %2413  ;;  %v1488_v12 = vmul.f32 %v3675_v23, %v3675_v23  ;;  %v3685_v0 = vadd.f32 %v1393_v5, %v3613_v51  ;;  %v1395_v15 = vpop.f32.mrb[11].mxu0  ;;  %v1674_v3 = vadd.f32 1.0, %v2412_v30  ;;  %v1704_v44 = vmul.f32 %v1672_v25, %v1448_v45 }
 0x1cf   : > { %v1489_v34 = vmul.f32 %v3678_v4, %v3678_v4  ;;  %v3691_v17 = vadd.f32 %v1395_v15, %v3616_v48  ;;  %v1675_v37 = vadd.f32 1.0, %v2414_v35  ;;  %v1705_v39 = vmul.f32 %v1673_v46, %v1449_v13 }
 0x1d0   : > { %v1520_v62 = vmul.f32 %v1488_v12, %v3675_v23  ;;  %v1490_v21 = vmul.f32 %v3685_v0, %v3685_v0  ;;  %v1706_v50 = vmul.f32 %v1674_v3, %v1450_v47 }
 0x1d1   : > { %v1521_v29 = vmul.f32 %v1489_v34, %v3678_v4  ;;  %v1491_v24 = vmul.f32 %v3691_v17, %v3691_v17  ;;  %v1707_v32 = vmul.f32 %v1675_v37, %v1451_v59 }
 0x1d2   : > { %v1552_v55 = vmul.f32 0.044715, %v1520_v62  ;;  %v1522_v38 = vmul.f32 %v1490_v21, %v3685_v0  ;;  %v1736_v41 = vpack.c.bf16 %v1706_v50, %v1704_v44 }
 0x1d3   : > { %v2416_v9 = vpop.eup %2415  ;;  %v1553_v33 = vmul.f32 0.044715, %v1521_v29  ;;  %v1523_v53 = vmul.f32 %v1491_v24, %v3691_v17  ;;  %v1737_v36 = vpack.c.bf16 %v1707_v32, %v1705_v39 }
 0x1d4   : > { %v2418_v28 = vpop.eup %2417  ;;  %v1584_v2 = vadd.f32 %v1552_v55, %v3675_v23  ;;  %v1554_v26 = vmul.f32 0.044715, %v1522_v38  ;;  %v1676_v11 = vadd.f32 1.0, %v2416_v9  ;;  %v1459_v9 = vmul.f32 0.5, %v3691_v17 }
 0x1d5   : > { %v2420_v49 = vpop.eup %2419  ;;  %v1585_v10 = vadd.f32 %v1553_v33, %v3678_v4  ;;  %v1555_v40 = vmul.f32 0.044715, %v1523_v53  ;;  %1916 = vmatprep.mubr.bf16.mxu1 %v1737_v36  ;;  %v1677_v54 = vadd.f32 1.0, %v2418_v28 }
 0x1d6   : > { %v2422_v20 = vpop.eup %2421  ;;  %v1616_v6 = vmul.f32 0.7978846, %v1584_v2  ;;  %v1586_v19 = vadd.f32 %v1554_v26, %v3685_v0  ;;  %1917 = vmatmul.mubr.bf16.vlgmr.msra.gmra.mrb[0].mxu1 %v1736_v41  ;;  %v1678_v31 = vadd.f32 1.0, %v2420_v49  ;;  %v1708_v27 = vmul.f32 %v1676_v11, %v1452_v63 }
 0x1d7   : > { %v1617_v22 = vmul.f32 0.7978846, %v1585_v10  ;;  %v1587_v57 = vadd.f32 %v1555_v40, %v3691_v17  ;;  %v1679_v61 = vadd.f32 1.0, %v2422_v20  ;;  %v1399_v56 = vpop.f32.mrb[12].mxu0  ;;  %v1709_v16 = vmul.f32 %v1677_v54, %v1453_v14 }
 0x1d8   : > { %2423 = vtanh.f32 %v1616_v6  ;;  %v1618_v60 = vmul.f32 0.7978846, %v1586_v19  ;;  %v1710_v42 = vmul.f32 %v1678_v31, %v1454_v18  ;;  %v3711_v25 = vadd.f32 %v1399_v56, %v3613_v51  ;;  %v1401_v30 = vpop.f32.mrb[13].mxu0 }
 0x1d9   : > { %2425 = vtanh.f32 %v1617_v22  ;;  %v1619_v58 = vmul.f32 0.7978846, %v1587_v57  ;;  %v1711_v5 = vmul.f32 %v1679_v61, %v1455_v52  ;;  %v3714_v43 = vadd.f32 %v1401_v30, %v3616_v48  ;;  %v1403_v13 = vpop.f32.mrb[14].mxu0 }
 0x1da   : > { %2427 = vtanh.f32 %v1618_v60  ;;  %v1738_v46 = vpack.c.bf16 %v1710_v42, %v1708_v27  ;;  %v1492_v45 = vmul.f32 %v3711_v25, %v3711_v25  ;;  %v3719_v35 = vadd.f32 %v1403_v13, %v3613_v51  ;;  %v1405_v12 = vpop.f32.mrb[15].mxu0 }
 0x1db   : > { %2429 = vtanh.f32 %v1619_v58  ;;  %v1739_v15 = vpack.c.bf16 %v1711_v5, %v1709_v16  ;;  %v1493_v47 = vmul.f32 %v3714_v43, %v3714_v43  ;;  %v3724_v3 = vadd.f32 %v1405_v12, %v3616_v48 }
 0x1dc   : > { %v1524_v34 = vmul.f32 %v1492_v45, %v3711_v25  ;;  %v1494_v59 = vmul.f32 %v3719_v35, %v3719_v35  ;;  %v1457_v41 = vmul.f32 0.5, %v3678_v4  ;;  %v1456_v14 = vmul.f32 0.5, %v3675_v23 }
 0x1dd   : > { %1924 = vmatprep.mubr.bf16.mxu1 %v1739_v15  ;;  %v1525_v37 = vmul.f32 %v1493_v47, %v3714_v43  ;;  %v1495_v62 = vmul.f32 %v3724_v3, %v3724_v3  ;;  %v1458_v49 = vmul.f32 0.5, %v3685_v0 }
 0x1de   : > { %1925 = vmatmul.mubr.bf16.gmra.mrb[4].mxu1 %v1738_v46  ;;  %v1556_v21 = vmul.f32 0.044715, %v1524_v34  ;;  %v1526_v44 = vmul.f32 %v1494_v59, %v3719_v35 }
 0x1df   : > { %v1557_v50 = vmul.f32 0.044715, %v1525_v37  ;;  %v1527_v29 = vmul.f32 %v1495_v62, %v3724_v3 }
 0x1e0   : > { %v1588_v24 = vadd.f32 %v1556_v21, %v3711_v25  ;;  %v1558_v39 = vmul.f32 0.044715, %v1526_v44  ;;  %v1461_v21 = vmul.f32 0.5, %v3714_v43  ;;  %v1460_v44 = vmul.f32 0.5, %v3711_v25 }
 0x1e1   : > { %v1589_v55 = vadd.f32 %v1557_v50, %v3714_v43  ;;  %v1559_v38 = vmul.f32 0.044715, %v1527_v29 }
 0x1e2   : > { %v2424_v32 = vpop.eup %2423  ;;  %v1620_v53 = vmul.f32 0.7978846, %v1588_v24  ;;  %v1590_v36 = vadd.f32 %v1558_v39, %v3719_v35  ;;  %v1462_v39 = vmul.f32 0.5, %v3719_v35 }
 0x1e3   : > { %v2426_v33 = vpop.eup %2425  ;;  %v1680_v28 = vadd.f32 1.0, %v2424_v32  ;;  %v1621_v26 = vmul.f32 0.7978846, %v1589_v55  ;;  %v1591_v52 = vadd.f32 %v1559_v38, %v3724_v3 }
 0x1e4   : > { %v2428_v2 = vpop.eup %2427  ;;  %v1681_v11 = vadd.f32 1.0, %v2426_v33  ;;  %2431 = vtanh.f32 %v1620_v53  ;;  %v1622_v40 = vmul.f32 0.7978846, %v1590_v36  ;;  %v1409_v4 = vpop.f32.mrb[16].mxu0 }
 0x1e5   : > { %v2430_v10 = vpop.eup %2429  ;;  %v1682_v54 = vadd.f32 1.0, %v2428_v2  ;;  %v1712_v17 = vmul.f32 %v1680_v28, %v1456_v14  ;;  %2433 = vtanh.f32 %v1621_v26  ;;  %v1623_v63 = vmul.f32 0.7978846, %v1591_v52  ;;  %v1411_v23 = vpop.f32.mrb[17].mxu0 }
 0x1e6   : > { %v3743_v20 = vadd.f32 %v1409_v4, %v3613_v51  ;;  %v1683_v6 = vadd.f32 1.0, %v2430_v10  ;;  %2435 = vtanh.f32 %v1622_v40  ;;  %v3746_v19 = vadd.f32 %v1411_v23, %v3616_v48  ;;  %v1413_v18 = vpop.f32.mrb[18].mxu0 }
 0x1e7   : > { %v1713_v31 = vmul.f32 %v1681_v11, %v1457_v41  ;;  %v1714_v0 = vmul.f32 %v1682_v54, %v1458_v49  ;;  %2437 = vtanh.f32 %v1623_v63  ;;  %v3751_v57 = vadd.f32 %v1413_v18, %v3613_v51  ;;  %v1415_v61 = vpop.f32.mrb[19].mxu0 }
 0x1e8   : > { %v1496_v22 = vmul.f32 %v3743_v20, %v3743_v20  ;;  %v1715_v27 = vmul.f32 %v1683_v6, %v1459_v9  ;;  %v1497_v60 = vmul.f32 %v3746_v19, %v3746_v19  ;;  %v3756_v56 = vadd.f32 %v1415_v61, %v3616_v48 }
 0x1e9   : > { %v1740_v16 = vpack.c.bf16 %v1714_v0, %v1712_v17  ;;  %v1498_v58 = vmul.f32 %v3751_v57, %v3751_v57  ;;  %v1463_v9 = vmul.f32 0.5, %v3724_v3 }
 0x1ea   : > { %v1528_v42 = vmul.f32 %v1496_v22, %v3743_v20  ;;  %v1741_v30 = vpack.c.bf16 %v1715_v27, %v1713_v31  ;;  %v1529_v5 = vmul.f32 %v1497_v60, %v3746_v19  ;;  %v1499_v13 = vmul.f32 %v3756_v56, %v3756_v56 }
 0x1eb   : > { %v1530_v45 = vmul.f32 %v1498_v58, %v3751_v57 }
 0x1ec   : > { %v1560_v46 = vmul.f32 0.044715, %v1528_v42  ;;  %1932 = vmatprep.mubr.bf16.mxu1 %v1741_v30  ;;  %v1561_v12 = vmul.f32 0.044715, %v1529_v5  ;;  %v1531_v15 = vmul.f32 %v1499_v13, %v3756_v56 }
 0x1ed   : > { %1933 = vmatmul.mubr.bf16.gmra.mrb[8].mxu1 %v1740_v16  ;;  %v1562_v34 = vmul.f32 0.044715, %v1530_v45 }
 0x1ee   : > { %v1592_v47 = vadd.f32 %v1560_v46, %v3743_v20  ;;  %v2432_v59 = vpop.eup %2431  ;;  %v1593_v37 = vadd.f32 %v1561_v12, %v3746_v19  ;;  %v1563_v62 = vmul.f32 0.044715, %v1531_v15  ;;  %v1465_v15 = vmul.f32 0.5, %v3746_v19 }
 0x1ef   : > { %v2434_v50 = vpop.eup %2433  ;;  %v1594_v24 = vadd.f32 %v1562_v34, %v3751_v57  ;;  %v1684_v32 = vadd.f32 1.0, %v2432_v59 }
 0x1f0   : > { %v1624_v29 = vmul.f32 0.7978846, %v1592_v47  ;;  %v2436_v55 = vpop.eup %2435  ;;  %v1625_v38 = vmul.f32 0.7978846, %v1593_v37  ;;  %v1595_v41 = vadd.f32 %v1563_v62, %v3756_v56  ;;  %v1685_v33 = vadd.f32 1.0, %v2434_v50 }
 0x1f1   : > { %v2438_v53 = vpop.eup %2437  ;;  %v1626_v36 = vmul.f32 0.7978846, %v1594_v24  ;;  %v1686_v14 = vadd.f32 1.0, %v2436_v55  ;;  %v1716_v25 = vmul.f32 %v1684_v32, %v1460_v44  ;;  %v1467_v55 = vmul.f32 0.5, %v3756_v56 }
 0x1f2   : > { %2439 = vtanh.f32 %v1624_v29  ;;  %v1419_v43 = vpop.f32.mrb[20].mxu0  ;;  %v1627_v28 = vmul.f32 0.7978846, %v1595_v41  ;;  %v1687_v26 = vadd.f32 1.0, %v2438_v53  ;;  %v1717_v3 = vmul.f32 %v1685_v33, %v1461_v21 }
 0x1f3   : > { %2441 = vtanh.f32 %v1625_v38  ;;  %v3775_v2 = vadd.f32 %v1419_v43, %v3613_v51  ;;  %v1421_v35 = vpop.f32.mrb[21].mxu0  ;;  %v1718_v49 = vmul.f32 %v1686_v14, %v1462_v39  ;;  %v1464_v21 = vmul.f32 0.5, %v3743_v20 }
 0x1f4   : > { %2443 = vtanh.f32 %v1626_v36  ;;  %v3778_v52 = vadd.f32 %v1421_v35, %v3616_v48  ;;  %v1423_v11 = vpop.f32.mrb[22].mxu0  ;;  %v1719_v54 = vmul.f32 %v1687_v26, %v1463_v9  ;;  %v1466_v29 = vmul.f32 0.5, %v3751_v57 }
 0x1f5   : > { %2445 = vtanh.f32 %v1627_v28  ;;  %v1500_v10 = vmul.f32 %v3775_v2, %v3775_v2  ;;  %v3783_v40 = vadd.f32 %v1423_v11, %v3613_v51  ;;  %v1425_v4 = vpop.f32.mrb[23].mxu0  ;;  %v1742_v23 = vpack.c.bf16 %v1718_v49, %v1716_v25 }
 0x1f6   : > { %v1501_v17 = vmul.f32 %v3778_v52, %v3778_v52  ;;  %v3788_v63 = vadd.f32 %v1425_v4, %v3616_v48  ;;  %v1743_v31 = vpack.c.bf16 %v1719_v54, %v1717_v3 }
 0x1f7   : > { %v1532_v6 = vmul.f32 %v1500_v10, %v3775_v2  ;;  %v1502_v18 = vmul.f32 %v3783_v40, %v3783_v40 }
 0x1f8   : > { %v1533_v0 = vmul.f32 %v1501_v17, %v3778_v52  ;;  %v1503_v22 = vmul.f32 %v3788_v63, %v3788_v63  ;;  %1940 = vmatprep.mubr.bf16.mxu1 %v1743_v31 }
 0x1f9   : > { %v1564_v61 = vmul.f32 0.044715, %v1532_v6  ;;  %v1534_v27 = vmul.f32 %v1502_v18, %v3783_v40  ;;  %1941 = vmatmul.mubr.bf16.gmra.mrb[12].mxu1 %v1742_v23 }
 0x1fa   : > { %v1565_v60 = vmul.f32 0.044715, %v1533_v0  ;;  %v1535_v16 = vmul.f32 %v1503_v22, %v3788_v63 }
 0x1fb   : > { %v1596_v42 = vadd.f32 %v1564_v61, %v3775_v2  ;;  %v1566_v58 = vmul.f32 0.044715, %v1534_v27  ;;  %v1469_v27 = vmul.f32 0.5, %v3778_v52 }
 0x1fc   : > { %v2440_v30 = vpop.eup %2439  ;;  %v1597_v5 = vadd.f32 %v1565_v60, %v3778_v52  ;;  %v1567_v13 = vmul.f32 0.044715, %v1535_v16 }
 0x1fd   : > { %v2442_v46 = vpop.eup %2441  ;;  %v1628_v45 = vmul.f32 0.7978846, %v1596_v42  ;;  %v1598_v12 = vadd.f32 %v1566_v58, %v3783_v40  ;;  %v1688_v47 = vadd.f32 1.0, %v2440_v30 }
 0x1fe   : > { %v2444_v34 = vpop.eup %2443  ;;  %v1629_v59 = vmul.f32 0.7978846, %v1597_v5  ;;  %v1599_v37 = vadd.f32 %v1567_v13, %v3788_v63  ;;  %v1689_v62 = vadd.f32 1.0, %v2442_v46  ;;  %v1468_v5 = vmul.f32 0.5, %v3775_v2 }
 0x1ff   : > { %v2446_v44 = vpop.eup %2445  ;;  %2447 = vtanh.f32 %v1628_v45  ;;  %v1630_v50 = vmul.f32 0.7978846, %v1598_v12  ;;  %v1690_v24 = vadd.f32 1.0, %v2444_v34  ;;  %v1720_v9 = vmul.f32 %v1688_v47, %v1464_v21 }
 0x200   : > { %2449 = vtanh.f32 %v1629_v59  ;;  %v1631_v39 = vmul.f32 0.7978846, %v1599_v37  ;;  %v1429_v32 = vpop.f32.mrb[24].mxu0  ;;  %v1691_v19 = vadd.f32 1.0, %v2446_v44  ;;  %v1721_v57 = vmul.f32 %v1689_v62, %v1465_v15 }
 0x201   : > { %2451 = vtanh.f32 %v1630_v50  ;;  %v3807_v38 = vadd.f32 %v1429_v32, %v3613_v51  ;;  %v1431_v41 = vpop.f32.mrb[25].mxu0  ;;  %v1722_v33 = vmul.f32 %v1690_v24, %v1466_v29  ;;  %v1470_v12 = vmul.f32 0.5, %v3783_v40 }
 0x202   : > { %2453 = vtanh.f32 %v1631_v39  ;;  %v3810_v20 = vadd.f32 %v1431_v41, %v3616_v48  ;;  %v1433_v53 = vpop.f32.mrb[26].mxu0  ;;  %v1723_v36 = vmul.f32 %v1691_v19, %v1467_v55  ;;  %v1471_v34 = vmul.f32 0.5, %v3788_v63 }
 0x203   : > { %v1504_v43 = vmul.f32 %v3807_v38, %v3807_v38  ;;  %v3815_v56 = vadd.f32 %v1433_v53, %v3613_v51  ;;  %v1435_v14 = vpop.f32.mrb[27].mxu0  ;;  %v1744_v25 = vpack.c.bf16 %v1722_v33, %v1720_v9 }
 0x204   : > { %v1505_v28 = vmul.f32 %v3810_v20, %v3810_v20  ;;  %v3820_v35 = vadd.f32 %v1435_v14, %v3616_v48  ;;  %v1745_v26 = vpack.c.bf16 %v1723_v36, %v1721_v57 }
 0x205   : > { %v1536_v11 = vmul.f32 %v1504_v43, %v3807_v38  ;;  %v1506_v3 = vmul.f32 %v3815_v56, %v3815_v56 }
 0x206   : > { %v1537_v49 = vmul.f32 %v1505_v28, %v3810_v20  ;;  %v1507_v10 = vmul.f32 %v3820_v35, %v3820_v35  ;;  %1948 = vmatprep.mubr.bf16.mxu1 %v1745_v26 }
 0x207   : > { %v1568_v4 = vmul.f32 0.044715, %v1536_v11  ;;  %v1538_v54 = vmul.f32 %v1506_v3, %v3815_v56  ;;  %1949 = vmatmul.mubr.bf16.gmra.mrb[16].mxu1 %v1744_v25 }
 0x208   : > { %v1569_v17 = vmul.f32 0.044715, %v1537_v49  ;;  %v1539_v23 = vmul.f32 %v1507_v10, %v3820_v35 }
 0x209   : > { %v2448_v6 = vpop.eup %2447  ;;  %v1600_v18 = vadd.f32 %v1568_v4, %v3807_v38  ;;  %v1570_v31 = vmul.f32 0.044715, %v1538_v54 }
 0x20a   : > { %v2450_v0 = vpop.eup %2449  ;;  %v1601_v22 = vadd.f32 %v1569_v17, %v3810_v20  ;;  %v1571_v61 = vmul.f32 0.044715, %v1539_v23  ;;  %v1692_v60 = vadd.f32 1.0, %v2448_v6  ;;  %v1473_v17 = vmul.f32 0.5, %v3810_v20 }
 0x20b   : > { %v2452_v16 = vpop.eup %2451  ;;  %v1632_v42 = vmul.f32 0.7978846, %v1600_v18  ;;  %v1602_v58 = vadd.f32 %v1570_v31, %v3815_v56  ;;  %v1693_v30 = vadd.f32 1.0, %v2450_v0  ;;  %v1474_v0 = vmul.f32 0.5, %v3815_v56 }
 0x20c   : > { %v2454_v13 = vpop.eup %2453  ;;  %v1633_v46 = vmul.f32 0.7978846, %v1601_v22  ;;  %v1603_v45 = vadd.f32 %v1571_v61, %v3820_v35  ;;  %v1694_v15 = vadd.f32 1.0, %v2452_v16  ;;  %v1724_v37 = vmul.f32 %v1692_v60, %v1468_v5 }
 0x20d   : > { %2455 = vtanh.f32 %v1632_v42  ;;  %v1634_v47 = vmul.f32 0.7978846, %v1602_v58  ;;  %v1695_v52 = vadd.f32 1.0, %v2454_v13  ;;  %v1725_v44 = vmul.f32 %v1693_v30, %v1469_v27 }
 0x20e   : > { %2457 = vtanh.f32 %v1633_v46  ;;  %v1635_v59 = vmul.f32 0.7978846, %v1603_v45  ;;  %v1726_v62 = vmul.f32 %v1694_v15, %v1470_v12  ;;  %v1439_v21 = vpop.f32.mrb[28].mxu0  ;;  %v1475_v60 = vmul.f32 0.5, %v3820_v35 }
 0x20f   : > { %2459 = vtanh.f32 %v1634_v47  ;;  %v1727_v2 = vmul.f32 %v1695_v52, %v1471_v34  ;;  %v1440_v50 = vadd.f32 %v1439_v21, %v3613_v51  ;;  %v1441_v29 = vpop.f32.mrb[29].mxu0 }
 0x210   : > { %2461 = vtanh.f32 %v1635_v59  ;;  %v1746_v24 = vpack.c.bf16 %v1726_v62, %v1724_v37  ;;  %v1442_v40 = vadd.f32 %v1441_v29, %v3616_v48  ;;  %v1443_v39 = vpop.f32.mrb[30].mxu0 }
 0x211   : > { %v1747_v32 = vpack.c.bf16 %v1727_v2, %v1725_v44  ;;  %v1508_v55 = vmul.f32 %v1440_v50, %v1440_v50  ;;  %v1444_v63 = vadd.f32 %v1443_v39, %v3613_v51  ;;  %v1445_v19 = vpop.f32.mrb[31].mxu0  ;;  %v1472_v51 = vmul.f32 0.5, %v3807_v38 }
 0x212   : > { %v1509_v41 = vmul.f32 %v1442_v40, %v1442_v40  ;;  %v1446_v9 = vadd.f32 %v1445_v19, %v3616_v48  ;;  %v1476_v34 = vmul.f32 0.5, %v1440_v50  ;;  %v1477_v37 = vmul.f32 0.5, %v1442_v40 }
 0x213   : > { %1956 = vmatprep.mubr.bf16.mxu1 %v1747_v32  ;;  %v1540_v33 = vmul.f32 %v1508_v55, %v1440_v50  ;;  %v1510_v53 = vmul.f32 %v1444_v63, %v1444_v63  ;;  %v1478_v52 = vmul.f32 0.5, %v1444_v63 }
 0x214   : > { %1957 = vmatmul.mubr.bf16.gmra.mrb[20].mxu1 %v1746_v24  ;;  %v1541_v57 = vmul.f32 %v1509_v41, %v1442_v40  ;;  %v1511_v36 = vmul.f32 %v1446_v9, %v1446_v9  ;;  %v1479_v62 = vmul.f32 0.5, %v1446_v9 }
 0x215   : > { %v1572_v43 = vmul.f32 0.044715, %v1540_v33  ;;  %v1542_v14 = vmul.f32 %v1510_v53, %v1444_v63 }
 0x216   : > { %v1573_v28 = vmul.f32 0.044715, %v1541_v57  ;;  %v1543_v26 = vmul.f32 %v1511_v36, %v1446_v9 }
 0x217   : > { %v2456_v25 = vpop.eup %2455  ;;  %v1604_v3 = vadd.f32 %v1572_v43, %v1440_v50  ;;  %v1574_v49 = vmul.f32 0.044715, %v1542_v14  ;;  %v2472_v50 = vld [vmem:[%s3946_s4] sm:$0xff] }
 0x218   : > { %v2458_v11 = vpop.eup %2457  ;;  %v1696_v10 = vadd.f32 1.0, %v2456_v25  ;;  %v1605_v54 = vadd.f32 %v1573_v28, %v1442_v40  ;;  %v1575_v48 = vmul.f32 0.044715, %v1543_v26  ;;  %v3851_v40 = vrot.slane %v2472_v50, %v706_v7  ;;  %v2473_v7 = vld [vmem:[%s2657_s25] sm:$0xff]  ;;  %v2474_v28 = vld [vmem:[%s2657_s25 + $0x8] sm:$0xff] }
 0x219   : > { %v2460_v4 = vpop.eup %2459  ;;  %v1697_v23 = vadd.f32 1.0, %v2458_v11  ;;  %v1636_v18 = vmul.f32 0.7978846, %v1604_v3  ;;  %v1606_v31 = vadd.f32 %v1574_v49, %v1444_v63  ;;  %v3855_v41 = vrot.slane %v2472_v50, %v776_v8 }
 0x21a   : > { %v2462_v6 = vpop.eup %2461  ;;  %v1698_v22 = vadd.f32 1.0, %v2460_v4  ;;  %v1637_v61 = vmul.f32 0.7978846, %v1605_v54  ;;  %v1607_v27 = vadd.f32 %v1575_v48, %v1446_v9  ;;  %v1728_v42 = vmul.f32 %v1696_v10, %v1472_v51  ;;  %v2475_v48 = vld [vmem:[%s2657_s25 + $0x10] sm:$0xff] }
 0x21b   : > { %v1699_v16 = vadd.f32 1.0, %v2462_v6  ;;  %2463 = vtanh.f32 %v1636_v18  ;;  %v1638_v38 = vmul.f32 0.7978846, %v1606_v31  ;;  %v1729_v5 = vmul.f32 %v1697_v23, %v1473_v17  ;;  %v2476_v6 = vld [vmem:[%s2657_s25 + $0x18] sm:$0xff] }
 0x21c   : > { %v1730_v58 = vmul.f32 %v1698_v22, %v1474_v0  ;;  %2465 = vtanh.f32 %v1637_v61  ;;  %v1639_v30 = vmul.f32 0.7978846, %v1607_v27 }
 0x21d   : > { %v1731_v20 = vmul.f32 %v1699_v16, %v1475_v60  ;;  %2467 = vtanh.f32 %v1638_v38 }
 0x21e   : > { %v1748_v13 = vpack.c.bf16 %v1730_v58, %v1728_v42  ;;  %2469 = vtanh.f32 %v1639_v30  ;;  %v2477_v58 = vld [vmem:[%s2657_s25 + $0x20] sm:$0xff] }
 0x21f   : > { %v1749_v46 = vpack.c.bf16 %v1731_v20, %v1729_v5  ;;  %v2478_v20 = vld [vmem:[%s2657_s25 + $0x28] sm:$0xff] }
 0x221   : > { %1964 = vmatprep.mubr.bf16.mxu1 %v1749_v46 }
 0x222   : > { %1965 = vmatmul.mubr.bf16.gmra.mrb[24].mxu1 %v1748_v13 }
 0x225   : > { %v2464_v56 = vpop.eup %2463 }
 0x226   : > { %v2466_v45 = vpop.eup %2465  ;;  %v1700_v12 = vadd.f32 1.0, %v2464_v56 }
 0x227   : > { %v2468_v15 = vpop.eup %2467  ;;  %v1701_v35 = vadd.f32 1.0, %v2466_v45 }
 0x228   : > { %v2470_v47 = vpop.eup %2469  ;;  %v1702_v59 = vadd.f32 1.0, %v2468_v15  ;;  %v1732_v44 = vmul.f32 %v1700_v12, %v1476_v34 }
 0x229   : > { %v1703_v21 = vadd.f32 1.0, %v2470_v47  ;;  %v1733_v29 = vmul.f32 %v1701_v35, %v1477_v37 }
 0x22a   : > { %v1734_v2 = vmul.f32 %v1702_v59, %v1478_v52  ;;  %v2479_v59 = vld [vmem:[%s2657_s25 + $0x30] sm:$0xff] }
 0x22b   : > { %v1735_v24 = vmul.f32 %v1703_v21, %v1479_v62  ;;  %v2480_v21 = vld [vmem:[%s2657_s25 + $0x38] sm:$0xff] }
 0x22c   : > { %v1750_v39 = vpack.c.bf16 %v1734_v2, %v1732_v44 }
 0x22d   : > { %v1751_v32 = vpack.c.bf16 %v1735_v24, %v1733_v29 }
 0x22f   : > { %1972 = vmatprep.mubr.bf16.mxu1 %v1751_v32 }
 0x230   : > { %1973 = vmatmul.mubr.bf16.gmra.mrb[28].mxu1 %v1750_v39 }
 0x2a9   : > { %v2245_v55 = vpop.f32.mrb[0].mxu1 }
 0x2aa   : > { %v2246_v63 = vpop.f32.mrb[1].mxu1 }
 0x2ab   : > { %v2247_v19 = vadd.f32 %v2246_v63, %v2245_v55  ;;  %v2248_v9 = vpop.f32.mrb[2].mxu1 }
 0x2ac   : > { %v2249_v33 = vpop.f32.mrb[3].mxu1 }
 0x2ad   : > { %v1919_v53 = vadd.f32 %v2247_v19, %v3851_v40  ;;  %v2250_v57 = vadd.f32 %v2249_v33, %v2248_v9  ;;  %v2481_v9 = vld [vmem:[%s2657_s25 + $0x40] sm:$0xff] }
 0x2af   : > { %v1985_v36 = vmul.f32 %v3855_v41, %v1919_v53  ;;  %v1922_v43 = vadd.f32 %v2250_v57, %v3851_v40  ;;  %v2482_v57 = vld [vmem:[%s2657_s25 + $0x48] sm:$0xff] }
 0x2b1   : > { %v2001_v1 = vadd.f32 %v2473_v7, %v1985_v36  ;;  %v1986_v8 = vmul.f32 %v3855_v41, %v1922_v43  ;;  %v2251_v14 = vpop.f32.mrb[4].mxu1 }
 0x2b2   : > { %v2252_v25 = vpop.f32.mrb[5].mxu1 }
 0x2b3   : > { %2017 = vst [vmem:[%s3864_s26] sm:$0xff] %v2001_v1  ;;  %v2002_v26 = vadd.f32 %v2474_v28, %v1986_v8  ;;  %v2253_v11 = vadd.f32 %v2252_v25, %v2251_v14  ;;  %v2254_v3 = vpop.f32.mrb[6].mxu1 }
 0x2b4   : > { %v2255_v49 = vpop.f32.mrb[7].mxu1 }
 0x2b5   : > { %2018 = vst [vmem:[%s3864_s26 + $0x8] sm:$0xff] %v2002_v26  ;;  %v1927_v51 = vadd.f32 %v2253_v11, %v3851_v40  ;;  %v2256_v10 = vadd.f32 %v2255_v49, %v2254_v3  ;;  %v2483_v3 = vld [vmem:[%s2657_s25 + $0x50] sm:$0xff] }
 0x2b7   : > { %v1987_v4 = vmul.f32 %v3855_v41, %v1927_v51  ;;  %v1930_v54 = vadd.f32 %v2256_v10, %v3851_v40  ;;  %v2484_v10 = vld [vmem:[%s2657_s25 + $0x58] sm:$0xff] }
 0x2b9   : > { %v2003_v17 = vadd.f32 %v2475_v48, %v1987_v4  ;;  %v1988_v23 = vmul.f32 %v3855_v41, %v1930_v54 }
 0x2bb   : > { %2019 = vst [vmem:[%s3864_s26 + $0x10] sm:$0xff] %v2003_v17  ;;  %v2004_v18 = vadd.f32 %v2476_v6, %v1988_v23 }
 0x2bd   : > { %2020 = vst [vmem:[%s3864_s26 + $0x18] sm:$0xff] %v2004_v18 }
 0x2c0   : > { %v2257_v31 = vpop.f32.mrb[8].mxu1 }
 0x2c1   : > { %v2258_v0 = vpop.f32.mrb[9].mxu1 }
 0x2c2   : > { %v2259_v22 = vadd.f32 %v2258_v0, %v2257_v31  ;;  %v2260_v61 = vpop.f32.mrb[10].mxu1 }
 0x2c3   : > { %v2261_v27 = vpop.f32.mrb[11].mxu1 }
 0x2c4   : > { %v1935_v60 = vadd.f32 %v2259_v22, %v3851_v40  ;;  %v2262_v16 = vadd.f32 %v2261_v27, %v2260_v61  ;;  %v2485_v61 = vld [vmem:[%s2657_s25 + $0x60] sm:$0xff] }
 0x2c6   : > { %v1989_v38 = vmul.f32 %v3855_v41, %v1935_v60  ;;  %v1938_v42 = vadd.f32 %v2262_v16, %v3851_v40  ;;  %v2486_v16 = vld [vmem:[%s2657_s25 + $0x68] sm:$0xff] }
 0x2c8   : > { %v2005_v30 = vadd.f32 %v2477_v58, %v1989_v38  ;;  %v1990_v5 = vmul.f32 %v3855_v41, %v1938_v42 }
 0x2ca   : > { %2021 = vst [vmem:[%s3864_s26 + $0x20] sm:$0xff] %v2005_v30  ;;  %v2006_v13 = vadd.f32 %v2478_v20, %v1990_v5 }
 0x2cc   : > { %2022 = vst [vmem:[%s3864_s26 + $0x28] sm:$0xff] %v2006_v13  ;;  %v2263_v46 = vpop.f32.mrb[12].mxu1 }
 0x2cd   : > { %v2264_v56 = vpop.f32.mrb[13].mxu1 }
 0x2ce   : > { %v2265_v45 = vadd.f32 %v2264_v56, %v2263_v46  ;;  %v2266_v12 = vpop.f32.mrb[14].mxu1 }
 0x2cf   : > { %v2267_v15 = vpop.f32.mrb[15].mxu1 }
 0x2d0   : > { %v1943_v35 = vadd.f32 %v2265_v45, %v3851_v40  ;;  %v2268_v47 = vadd.f32 %v2267_v15, %v2266_v12  ;;  %v2487_v12 = vld [vmem:[%s2657_s25 + $0x70] sm:$0xff] }
 0x2d2   : > { %v1991_v34 = vmul.f32 %v3855_v41, %v1943_v35  ;;  %v1946_v52 = vadd.f32 %v2268_v47, %v3851_v40  ;;  %v2488_v47 = vld [vmem:[%s2657_s25 + $0x78] sm:$0xff] }
 0x2d4   : > { %v2007_v37 = vadd.f32 %v2479_v59, %v1991_v34  ;;  %v1992_v62 = vmul.f32 %v3855_v41, %v1946_v52 }
 0x2d6   : > { %2023 = vst [vmem:[%s3864_s26 + $0x30] sm:$0xff] %v2007_v37  ;;  %v2008_v44 = vadd.f32 %v2480_v21, %v1992_v62 }
 0x2d8   : > { %2024 = vst [vmem:[%s3864_s26 + $0x38] sm:$0xff] %v2008_v44 }
 0x2da   : > { %v2269_v2 = vpop.f32.mrb[16].mxu1 }
 0x2db   : > { %v2270_v29 = vpop.f32.mrb[17].mxu1 }
 0x2dc   : > { %v2271_v24 = vadd.f32 %v2270_v29, %v2269_v2  ;;  %v2272_v39 = vpop.f32.mrb[18].mxu1 }
 0x2dd   : > { %v2273_v32 = vpop.f32.mrb[19].mxu1 }
 0x2de   : > { %v1951_v55 = vadd.f32 %v2271_v24, %v3851_v40  ;;  %v2274_v50 = vadd.f32 %v2273_v32, %v2272_v39 }
 0x2e0   : > { %v1993_v63 = vmul.f32 %v3855_v41, %v1951_v55  ;;  %v1954_v19 = vadd.f32 %v2274_v50, %v3851_v40 }
 0x2e2   : > { %v2009_v33 = vadd.f32 %v2481_v9, %v1993_v63  ;;  %v1994_v53 = vmul.f32 %v3855_v41, %v1954_v19 }
 0x2e4   : > { %2025 = vst [vmem:[%s3864_s26 + $0x40] sm:$0xff] %v2009_v33  ;;  %v2010_v36 = vadd.f32 %v2482_v57, %v1994_v53 }
 0x2e6   : > { %2026 = vst [vmem:[%s3864_s26 + $0x48] sm:$0xff] %v2010_v36 }
 0x2e7   : > { %v2275_v43 = vpop.f32.mrb[20].mxu1 }
 0x2e8   : > { %v2276_v7 = vpop.f32.mrb[21].mxu1 }
 0x2e9   : > { %v2277_v1 = vadd.f32 %v2276_v7, %v2275_v43  ;;  %v2278_v8 = vpop.f32.mrb[22].mxu1 }
 0x2ea   : > { %v2279_v14 = vpop.f32.mrb[23].mxu1 }
 0x2eb   : > { %v1959_v25 = vadd.f32 %v2277_v1, %v3851_v40  ;;  %v2280_v28 = vadd.f32 %v2279_v14, %v2278_v8 }
 0x2ed   : > { %v1995_v26 = vmul.f32 %v3855_v41, %v1959_v25  ;;  %v1962_v11 = vadd.f32 %v2280_v28, %v3851_v40 }
 0x2ef   : > { %v2011_v49 = vadd.f32 %v2483_v3, %v1995_v26  ;;  %v1996_v51 = vmul.f32 %v3855_v41, %v1962_v11 }
 0x2f1   : > { %2027 = vst [vmem:[%s3864_s26 + $0x50] sm:$0xff] %v2011_v49  ;;  %v2012_v4 = vadd.f32 %v2484_v10, %v1996_v51 }
 0x2f3   : > { %2028 = vst [vmem:[%s3864_s26 + $0x58] sm:$0xff] %v2012_v4 }
 0x2f5   : > { %v2281_v54 = vpop.f32.mrb[24].mxu1 }
 0x2f6   : > { %v2282_v48 = vpop.f32.mrb[25].mxu1 }
 0x2f7   : > { %v2283_v17 = vadd.f32 %v2282_v48, %v2281_v54  ;;  %v2284_v23 = vpop.f32.mrb[26].mxu1 }
 0x2f8   : > { %v2285_v6 = vpop.f32.mrb[27].mxu1 }
 0x2f9   : > { %v1967_v18 = vadd.f32 %v2283_v17, %v3851_v40  ;;  %v2286_v31 = vadd.f32 %v2285_v6, %v2284_v23 }
 0x2fb   : > { %v1997_v0 = vmul.f32 %v3855_v41, %v1967_v18  ;;  %v1970_v22 = vadd.f32 %v2286_v31, %v3851_v40 }
 0x2fd   : > { %v2013_v27 = vadd.f32 %v2485_v61, %v1997_v0  ;;  %v1998_v60 = vmul.f32 %v3855_v41, %v1970_v22 }
 0x2ff   : > { %2029 = vst [vmem:[%s3864_s26 + $0x60] sm:$0xff] %v2013_v27  ;;  %v2014_v38 = vadd.f32 %v2486_v16, %v1998_v60 }
 0x301   : > { %2030 = vst [vmem:[%s3864_s26 + $0x68] sm:$0xff] %v2014_v38 }
 0x303   : > { %v2287_v42 = vpop.f32.mrb[28].mxu1 }
 0x304   : > { %v2288_v58 = vpop.f32.mrb[29].mxu1 }
 0x305   : > { %v2289_v30 = vadd.f32 %v2288_v58, %v2287_v42  ;;  %v2290_v5 = vpop.f32.mrb[30].mxu1 }
 0x306   : > { %v2291_v20 = vpop.f32.mrb[31].mxu1 }
 0x307   : > { %v1975_v13 = vadd.f32 %v2289_v30, %v3851_v40  ;;  %v2292_v46 = vadd.f32 %v2291_v20, %v2290_v5 }
 0x309   : > { %v1999_v56 = vmul.f32 %v3855_v41, %v1975_v13  ;;  %v1978_v45 = vadd.f32 %v2292_v46, %v3851_v40 }
 0x30b   : > { %v2015_v15 = vadd.f32 %v2487_v12, %v1999_v56  ;;  %v2000_v35 = vmul.f32 %v3855_v41, %v1978_v45 }
 0x30d   : > { %2031 = vst [vmem:[%s3864_s26 + $0x70] sm:$0xff] %v2015_v15  ;;  %v2016_v34 = vadd.f32 %v2488_v47, %v2000_v35 }
 0x30f   : > { %2032 = vst [vmem:[%s3864_s26 + $0x78] sm:$0xff] %v2016_v34 }
 0x310 PF: > { %s18_s9 = sadd.s32 1, %s2527_s9   ;;  %s3952_s27 = smov %s2519_s29 }
 0x311   : > { %p15_p12 = scmp.ge.s32.totalorder %s18_s9, 8   ;;  %s3953_s28 = smov %s2523_s30 }
 0x312   : > { %s3954_s29 = smov %s3957_s10  ;;  %s3955_s30 = smov %s3961_s11 }
 0x313   :  { %17 = sbr.rel (!%p15_p12) target bundleno = 3 (0x3), region = 88 }

</bundles_post_ra>
